<compile_context>
chip_gen: v6e
topology: v6e:2x2x1
jax: 0.10.0
libtpu: 0.0.40
codegen_flags: <defaults>
</compile_context>

<pallas_src>
import jax
import jax.numpy as jnp
from jax.experimental import pallas as pl
from jax.experimental.pallas import tpu as pltpu

IN_DIM = 10      # 9 (flattened rotation matrix) + 1 (scale s)
IN_PAD = 16      # zero-padded input feature width (sublane-friendly)
HIDDEN = 256
MU_DIM = 6
OUT_PAD = 128    # lane-dense fused head width: cols 0:6 = mu, col 6 = scale, rest 0
LEAKY_SLOPE = 0.01
TB = 128         # batch tile (multiple of 128; sweep 128-256 on v6e/v7x)


# ---------------------------------------------------------------------------
# Pallas kernel: the MLP / matmul hot path
# ---------------------------------------------------------------------------
def _softplus(x):
    # numerically stable softplus (matches torch.nn.functional.softplus)
    return jnp.maximum(x, 0.0) + jnp.log1p(jnp.exp(-jnp.abs(x)))


def mlp_kernel(x_ref,
               w1, b1, w2, b2, w3, b3, w4, b4, w5, b5,
               w_head, b_head,
               out_ref):
    h = x_ref[...].astype(jnp.bfloat16)                        # (TB, 16) bf16
    for w, b in ((w1, b1), (w2, b2), (w3, b3), (w4, b4), (w5, b5)):
        y = jnp.dot(h, w[...], preferred_element_type=jnp.float32) + b[...]
        y = jnp.where(y > 0, y, LEAKY_SLOPE * y)               # LeakyReLU, f32
        h = y.astype(jnp.bfloat16)                             # (TB, 256) bf16
    # Fused head: cols 0:6 -> mu ; col 6 -> pre-activation scale ; cols 7:127 -> 0
    y = jnp.dot(h, w_head[...], preferred_element_type=jnp.float32) + b_head[...]
    col = jax.lax.broadcasted_iota(jnp.int32, y.shape, 1)
    out_ref[...] = jnp.where(col == MU_DIM, _softplus(y) + 1e-4, y)


def run_mlp(concat_padded, kparams, *, tb=TB):
    """concat_padded: (Bp, 16) f32 with Bp % tb == 0. Returns (Bp, 128) f32 slab."""
    Bp = concat_padded.shape[0]
    assert Bp % tb == 0

    in_specs = [pl.BlockSpec((tb, IN_PAD), lambda i: (i, 0))]
    for p in kparams:                                          # grid-invariant weights
        in_specs.append(pl.BlockSpec(p.shape, lambda i: (0, 0)))

    out_shape = jax.ShapeDtypeStruct((Bp, OUT_PAD), jnp.float32)
    out_specs = pl.BlockSpec((tb, OUT_PAD), lambda i: (i, 0))

    grid_spec = pltpu.PrefetchScalarGridSpec(
        num_scalar_prefetch=0,
        grid=(Bp // tb,),
        in_specs=in_specs,
        out_specs=out_specs,
    )

    return pl.pallas_call(
        mlp_kernel,
        out_shape=out_shape,
        grid_spec=grid_spec,
        compiler_params=pltpu.CompilerParams(
            dimension_semantics=("parallel",)),
    )(concat_padded, *kparams)


# ---------------------------------------------------------------------------
# Parameter packing for the kernel (done once, outside the hot path)
# ---------------------------------------------------------------------------
def pack_params(params):
    """Torch-style f32 params -> kernel params (bf16 weights, fused padded head)."""
    (w1, b1, w2, b2, w3, b3, w4, b4, w5, b5, wmu, bmu, wsc, bsc) = params

    # pad first-layer contraction dim 10 -> 16 with zero rows
    w1p = jnp.zeros((IN_PAD, HIDDEN), jnp.float32).at[:IN_DIM].set(w1)

    # fused head: [W_mu | W_mu @ W_scale | 0...], biases composed the same way
    w_head = jnp.zeros((HIDDEN, OUT_PAD), jnp.float32)
    w_head = w_head.at[:, :MU_DIM].set(wmu)
    w_head = w_head.at[:, MU_DIM:MU_DIM + 1].set(wmu @ wsc)
    b_head = jnp.zeros((1, OUT_PAD), jnp.float32)
    b_head = b_head.at[:, :MU_DIM].set(bmu)
    b_head = b_head.at[:, MU_DIM:MU_DIM + 1].set(bmu @ wsc + bsc)

    bf = jnp.bfloat16
    return (w1p.astype(bf), b1,
            w2.astype(bf), b2,
            w3.astype(bf), b3,
            w4.astype(bf), b4,
            w5.astype(bf), b5,
            w_head.astype(bf), b_head)


# ---------------------------------------------------------------------------
# Plain-JAX glue: quaternion <-> rotation matrix, Gram-Schmidt
# ---------------------------------------------------------------------------
def quat_to_rotmat(q):
    """q: (B, 4) unit quaternion in (x, y, z, w). Returns (B, 3, 3)."""
    x, y, z, w = q[:, 0], q[:, 1], q[:, 2], q[:, 3]
    xx, yy, zz = x * x, y * y, z * z
    xy, xz, yz = x * y, x * z, y * z
    wx, wy, wz = w * x, w * y, w * z
    r = jnp.stack([
        1 - 2 * (yy + zz), 2 * (xy - wz),     2 * (xz + wy),
        2 * (xy + wz),     1 - 2 * (xx + zz), 2 * (yz - wx),
        2 * (xz - wy),     2 * (yz + wx),     1 - 2 * (xx + yy),
    ], axis=-1)
    return r.reshape(-1, 3, 3)


def rotmat_to_quat(m):
    """m: (B, 3, 3) proper rotation. Returns (B, 4) quaternion (x, y, z, w), w >= 0."""
    m00, m01, m02 = m[:, 0, 0], m[:, 0, 1], m[:, 0, 2]
    m10, m11, m12 = m[:, 1, 0], m[:, 1, 1], m[:, 1, 2]
    m20, m21, m22 = m[:, 2, 0], m[:, 2, 1], m[:, 2, 2]

    def sgn(v):
        return jnp.where(v >= 0, 1.0, -1.0)

    qw = 0.5 * jnp.sqrt(jnp.maximum(0.0, 1.0 + m00 + m11 + m22))
    qx = 0.5 * jnp.sqrt(jnp.maximum(0.0, 1.0 + m00 - m11 - m22)) * sgn(m21 - m12)
    qy = 0.5 * jnp.sqrt(jnp.maximum(0.0, 1.0 - m00 + m11 - m22)) * sgn(m02 - m20)
    qz = 0.5 * jnp.sqrt(jnp.maximum(0.0, 1.0 - m00 - m11 + m22)) * sgn(m10 - m01)
    return jnp.stack([qx, qy, qz, qw], axis=-1)


@jax.jit
def simple_mlp_forward(kparams, q_in, s):
    """Mirrors SimpleMLP.forward(x, s): x is a quaternion (B,4), s is (B,1)."""
    B = q_in.shape[0]
    rot = quat_to_rotmat(q_in).reshape(-1, 9)                  # (B, 9)
    concat = jnp.concatenate(
        [rot, s, jnp.zeros((B, IN_PAD - IN_DIM), jnp.float32)], axis=-1)  # (B, 16)

    # pad batch to a multiple of the tile (padded rows are sliced away below)
    Bp = ((B + TB - 1) // TB) * TB
    if Bp != B:
        concat = jnp.pad(concat, ((0, Bp - B), (0, 0)))

    out = run_mlp(concat, kparams)                             # (Bp, 128) hot path
    mu = out[:B, :MU_DIM]                                      # (B, 6)
    scale = out[:B, MU_DIM:MU_DIM + 1]                         # (B, 1), softplus+1e-4 done in kernel

    # Gram-Schmidt orthonormalization (6D rotation representation -> matrix)
    r1 = mu[:, 0:3]
    r1 = r1 / jnp.linalg.norm(r1, axis=-1, keepdims=True)
    r3 = jnp.cross(r1, mu[:, 3:6])
    r3 = r3 / jnp.linalg.norm(r3, axis=-1, keepdims=True)
    r2 = jnp.cross(r3, r1)
    rotation_matrix = jnp.stack([r1, r2, r3], axis=-1)         # (B, 3, 3), columns R1,R2,R3

    # lietorch.SO3(..., from_rotation_matrix=True) -> quaternion (x,y,z,w), w >= 0
    quat = rotmat_to_quat(rotation_matrix)
    return quat, scale


# ---------------------------------------------------------------------------
# Deterministic parameter init (PyTorch nn.Linear-style uniform), f32
# ---------------------------------------------------------------------------
def init_params(key):
    dims = [(IN_DIM, HIDDEN), (HIDDEN, HIDDEN), (HIDDEN, HIDDEN),
            (HIDDEN, HIDDEN), (HIDDEN, HIDDEN),     # mlp
            (HIDDEN, MU_DIM),                       # layer_mu
            (MU_DIM, 1)]                            # layer_scale
    params = []
    for (fan_in, fan_out) in dims:
        key, kw, kb = jax.random.split(key, 3)
        bound = 1.0 / jnp.sqrt(fan_in)
        w = jax.random.uniform(kw, (fan_in, fan_out), jnp.float32, -bound, bound)
        b = jax.random.uniform(kb, (1, fan_out), jnp.float32, -bound, bound)
        params.extend([w, b])
    return tuple(params)


# ---------------------------------------------------------------------------
if __name__ == "__main__":
    key = jax.random.PRNGKey(0)
    k_p, k_q, k_s = jax.random.split(key, 3)

    B = 16
    params = init_params(k_p)
    kparams = pack_params(params)       # one-time: bf16 weights, fused padded head

    # input quaternion (x, y, z, w), normalized to unit length
    q_raw = jax.random.normal(k_q, (B, 4), jnp.float32)
    q_in = q_raw / jnp.linalg.norm(q_raw, axis=-1, keepdims=True)
    s = jax.random.normal(k_s, (B, 1), jnp.float32)

    quat, scale = simple_mlp_forward(kparams, q_in, s)
    jax.block_until_ready((quat, scale))

    assert quat.shape == (B, 4) and scale.shape == (B, 1)
    assert bool(jnp.all(jnp.isfinite(quat))) and bool(jnp.all(scale > 0))
    print("KERNEL_OK")
</pallas_src>

<mosaic_0001>
module attributes {stable_mosaic.version = 11 : i64} {
  func.func @mlp_kernel(%arg0: i32, %arg1: memref<128x16xf32, #tpu.memory_space<vmem>>, %arg2: memref<16x256xbf16, #tpu.memory_space<vmem>>, %arg3: memref<1x256xf32, #tpu.memory_space<vmem>>, %arg4: memref<256x256xbf16, #tpu.memory_space<vmem>>, %arg5: memref<1x256xf32, #tpu.memory_space<vmem>>, %arg6: memref<256x256xbf16, #tpu.memory_space<vmem>>, %arg7: memref<1x256xf32, #tpu.memory_space<vmem>>, %arg8: memref<256x256xbf16, #tpu.memory_space<vmem>>, %arg9: memref<1x256xf32, #tpu.memory_space<vmem>>, %arg10: memref<256x256xbf16, #tpu.memory_space<vmem>>, %arg11: memref<1x256xf32, #tpu.memory_space<vmem>>, %arg12: memref<256x128xbf16, #tpu.memory_space<vmem>>, %arg13: memref<1x128xf32, #tpu.memory_space<vmem>>, %arg14: memref<128x128xf32, #tpu.memory_space<vmem>>) attributes {dimension_semantics = [#tpu.dimension_semantics<parallel>], iteration_bounds = array<i64: 1>, scalar_prefetch = 0 : i64, scratch_operands = 0 : i64, tpu.core_type = #tpu.core_type<tc>, window_params = [{transform_indices = @transform_0, window_bounds = array<i64: 128, 16>}, {pipeline_mode = #tpu.pipeline_mode<synchronous>, transform_indices = @transform_1, window_bounds = array<i64: 16, 256>}, {pipeline_mode = #tpu.pipeline_mode<synchronous>, transform_indices = @transform_2, window_bounds = array<i64: 1, 256>}, {pipeline_mode = #tpu.pipeline_mode<synchronous>, transform_indices = @transform_3, window_bounds = array<i64: 256, 256>}, {pipeline_mode = #tpu.pipeline_mode<synchronous>, transform_indices = @transform_4, window_bounds = array<i64: 1, 256>}, {pipeline_mode = #tpu.pipeline_mode<synchronous>, transform_indices = @transform_5, window_bounds = array<i64: 256, 256>}, {pipeline_mode = #tpu.pipeline_mode<synchronous>, transform_indices = @transform_6, window_bounds = array<i64: 1, 256>}, {pipeline_mode = #tpu.pipeline_mode<synchronous>, transform_indices = @transform_7, window_bounds = array<i64: 256, 256>}, {pipeline_mode = #tpu.pipeline_mode<synchronous>, transform_indices = @transform_8, window_bounds = array<i64: 1, 256>}, {pipeline_mode = #tpu.pipeline_mode<synchronous>, transform_indices = @transform_9, window_bounds = array<i64: 256, 256>}, {pipeline_mode = #tpu.pipeline_mode<synchronous>, transform_indices = @transform_10, window_bounds = array<i64: 1, 256>}, {pipeline_mode = #tpu.pipeline_mode<synchronous>, transform_indices = @transform_11, window_bounds = array<i64: 256, 128>}, {pipeline_mode = #tpu.pipeline_mode<synchronous>, transform_indices = @transform_12, window_bounds = array<i64: 1, 128>}, {transform_indices = @transform_13, window_bounds = array<i64: 128, 128>}]} {
    %c0 = arith.constant 0 : index
    %c0_0 = arith.constant 0 : index
    %0 = vector.load %arg1[%c0, %c0_0] : memref<128x16xf32, #tpu.memory_space<vmem>>, vector<128x16xf32>
    %1 = arith.truncf %0 : vector<128x16xf32> to vector<128x16xbf16>
    %c0_1 = arith.constant 0 : index
    %c0_2 = arith.constant 0 : index
    %2 = vector.load %arg2[%c0_1, %c0_2] : memref<16x256xbf16, #tpu.memory_space<vmem>>, vector<16x256xbf16>
    %cst = arith.constant dense<0.000000e+00> : vector<128x256xf32>
    %3 = tpu.matmul %1, %2, %cst {dimension_numbers = #tpu.dot_dimension_numbers<[1], [0], [0], [1], [0, 0, 1, 1], [], []>} : vector<128x16xbf16>, vector<16x256xbf16>, vector<128x256xf32> -> vector<128x256xf32>
    %c0_3 = arith.constant 0 : index
    %c0_4 = arith.constant 0 : index
    %4 = vector.load %arg3[%c0_3, %c0_4] : memref<1x256xf32, #tpu.memory_space<vmem>>, vector<1x256xf32>
    %5 = vector.broadcast %4 : vector<1x256xf32> to vector<128x256xf32>
    %6 = arith.addf %3, %5 : vector<128x256xf32>
    %cst_5 = arith.constant 0.000000e+00 : f32
    %7 = vector.broadcast %cst_5 : f32 to vector<128x256xf32>
    %8 = arith.cmpf ogt, %6, %7 : vector<128x256xf32>
    %cst_6 = arith.constant 0.00999999977 : f32
    %9 = vector.broadcast %cst_6 : f32 to vector<128x256xf32>
    %10 = arith.mulf %9, %6 : vector<128x256xf32>
    %11 = arith.select %8, %6, %10 : vector<128x256xi1>, vector<128x256xf32>
    %12 = arith.truncf %11 : vector<128x256xf32> to vector<128x256xbf16>
    %c0_7 = arith.constant 0 : index
    %c0_8 = arith.constant 0 : index
    %13 = vector.load %arg4[%c0_7, %c0_8] : memref<256x256xbf16, #tpu.memory_space<vmem>>, vector<256x256xbf16>
    %cst_9 = arith.constant dense<0.000000e+00> : vector<128x256xf32>
    %14 = tpu.matmul %12, %13, %cst_9 {dimension_numbers = #tpu.dot_dimension_numbers<[1], [0], [0], [1], [0, 0, 1, 1], [], []>} : vector<128x256xbf16>, vector<256x256xbf16>, vector<128x256xf32> -> vector<128x256xf32>
    %c0_10 = arith.constant 0 : index
    %c0_11 = arith.constant 0 : index
    %15 = vector.load %arg5[%c0_10, %c0_11] : memref<1x256xf32, #tpu.memory_space<vmem>>, vector<1x256xf32>
    %16 = vector.broadcast %15 : vector<1x256xf32> to vector<128x256xf32>
    %17 = arith.addf %14, %16 : vector<128x256xf32>
    %cst_12 = arith.constant 0.000000e+00 : f32
    %18 = vector.broadcast %cst_12 : f32 to vector<128x256xf32>
    %19 = arith.cmpf ogt, %17, %18 : vector<128x256xf32>
    %cst_13 = arith.constant 0.00999999977 : f32
    %20 = vector.broadcast %cst_13 : f32 to vector<128x256xf32>
    %21 = arith.mulf %20, %17 : vector<128x256xf32>
    %22 = arith.select %19, %17, %21 : vector<128x256xi1>, vector<128x256xf32>
    %23 = arith.truncf %22 : vector<128x256xf32> to vector<128x256xbf16>
    %c0_14 = arith.constant 0 : index
    %c0_15 = arith.constant 0 : index
    %24 = vector.load %arg6[%c0_14, %c0_15] : memref<256x256xbf16, #tpu.memory_space<vmem>>, vector<256x256xbf16>
    %cst_16 = arith.constant dense<0.000000e+00> : vector<128x256xf32>
    %25 = tpu.matmul %23, %24, %cst_16 {dimension_numbers = #tpu.dot_dimension_numbers<[1], [0], [0], [1], [0, 0, 1, 1], [], []>} : vector<128x256xbf16>, vector<256x256xbf16>, vector<128x256xf32> -> vector<128x256xf32>
    %c0_17 = arith.constant 0 : index
    %c0_18 = arith.constant 0 : index
    %26 = vector.load %arg7[%c0_17, %c0_18] : memref<1x256xf32, #tpu.memory_space<vmem>>, vector<1x256xf32>
    %27 = vector.broadcast %26 : vector<1x256xf32> to vector<128x256xf32>
    %28 = arith.addf %25, %27 : vector<128x256xf32>
    %cst_19 = arith.constant 0.000000e+00 : f32
    %29 = vector.broadcast %cst_19 : f32 to vector<128x256xf32>
    %30 = arith.cmpf ogt, %28, %29 : vector<128x256xf32>
    %cst_20 = arith.constant 0.00999999977 : f32
    %31 = vector.broadcast %cst_20 : f32 to vector<128x256xf32>
    %32 = arith.mulf %31, %28 : vector<128x256xf32>
    %33 = arith.select %30, %28, %32 : vector<128x256xi1>, vector<128x256xf32>
    %34 = arith.truncf %33 : vector<128x256xf32> to vector<128x256xbf16>
    %c0_21 = arith.constant 0 : index
    %c0_22 = arith.constant 0 : index
    %35 = vector.load %arg8[%c0_21, %c0_22] : memref<256x256xbf16, #tpu.memory_space<vmem>>, vector<256x256xbf16>
    %cst_23 = arith.constant dense<0.000000e+00> : vector<128x256xf32>
    %36 = tpu.matmul %34, %35, %cst_23 {dimension_numbers = #tpu.dot_dimension_numbers<[1], [0], [0], [1], [0, 0, 1, 1], [], []>} : vector<128x256xbf16>, vector<256x256xbf16>, vector<128x256xf32> -> vector<128x256xf32>
    %c0_24 = arith.constant 0 : index
    %c0_25 = arith.constant 0 : index
    %37 = vector.load %arg9[%c0_24, %c0_25] : memref<1x256xf32, #tpu.memory_space<vmem>>, vector<1x256xf32>
    %38 = vector.broadcast %37 : vector<1x256xf32> to vector<128x256xf32>
    %39 = arith.addf %36, %38 : vector<128x256xf32>
    %cst_26 = arith.constant 0.000000e+00 : f32
    %40 = vector.broadcast %cst_26 : f32 to vector<128x256xf32>
    %41 = arith.cmpf ogt, %39, %40 : vector<128x256xf32>
    %cst_27 = arith.constant 0.00999999977 : f32
    %42 = vector.broadcast %cst_27 : f32 to vector<128x256xf32>
    %43 = arith.mulf %42, %39 : vector<128x256xf32>
    %44 = arith.select %41, %39, %43 : vector<128x256xi1>, vector<128x256xf32>
    %45 = arith.truncf %44 : vector<128x256xf32> to vector<128x256xbf16>
    %c0_28 = arith.constant 0 : index
    %c0_29 = arith.constant 0 : index
    %46 = vector.load %arg10[%c0_28, %c0_29] : memref<256x256xbf16, #tpu.memory_space<vmem>>, vector<256x256xbf16>
    %cst_30 = arith.constant dense<0.000000e+00> : vector<128x256xf32>
    %47 = tpu.matmul %45, %46, %cst_30 {dimension_numbers = #tpu.dot_dimension_numbers<[1], [0], [0], [1], [0, 0, 1, 1], [], []>} : vector<128x256xbf16>, vector<256x256xbf16>, vector<128x256xf32> -> vector<128x256xf32>
    %c0_31 = arith.constant 0 : index
    %c0_32 = arith.constant 0 : index
    %48 = vector.load %arg11[%c0_31, %c0_32] : memref<1x256xf32, #tpu.memory_space<vmem>>, vector<1x256xf32>
    %49 = vector.broadcast %48 : vector<1x256xf32> to vector<128x256xf32>
    %50 = arith.addf %47, %49 : vector<128x256xf32>
    %cst_33 = arith.constant 0.000000e+00 : f32
    %51 = vector.broadcast %cst_33 : f32 to vector<128x256xf32>
    %52 = arith.cmpf ogt, %50, %51 : vector<128x256xf32>
    %cst_34 = arith.constant 0.00999999977 : f32
    %53 = vector.broadcast %cst_34 : f32 to vector<128x256xf32>
    %54 = arith.mulf %53, %50 : vector<128x256xf32>
    %55 = arith.select %52, %50, %54 : vector<128x256xi1>, vector<128x256xf32>
    %56 = arith.truncf %55 : vector<128x256xf32> to vector<128x256xbf16>
    %c0_35 = arith.constant 0 : index
    %c0_36 = arith.constant 0 : index
    %57 = vector.load %arg12[%c0_35, %c0_36] : memref<256x128xbf16, #tpu.memory_space<vmem>>, vector<256x128xbf16>
    %cst_37 = arith.constant dense<0.000000e+00> : vector<128x128xf32>
    %58 = tpu.matmul %56, %57, %cst_37 {dimension_numbers = #tpu.dot_dimension_numbers<[1], [0], [0], [1], [0, 0, 1, 1], [], []>} : vector<128x256xbf16>, vector<256x128xbf16>, vector<128x128xf32> -> vector<128x128xf32>
    %c0_38 = arith.constant 0 : index
    %c0_39 = arith.constant 0 : index
    %59 = vector.load %arg13[%c0_38, %c0_39] : memref<1x128xf32, #tpu.memory_space<vmem>>, vector<1x128xf32>
    %60 = vector.broadcast %59 : vector<1x128xf32> to vector<128x128xf32>
    %61 = arith.addf %58, %60 : vector<128x128xf32>
    %62 = tpu.iota {dimensions = array<i32: 1>} : vector<128x128xi32>
    %c6_i32 = arith.constant 6 : i32
    %63 = vector.broadcast %c6_i32 : i32 to vector<128x128xi32>
    %64 = arith.cmpi eq, %62, %63 : vector<128x128xi32>
    %cst_40 = arith.constant 0.000000e+00 : f32
    %65 = vector.broadcast %cst_40 : f32 to vector<128x128xf32>
    %66 = arith.maximumf %61, %65 : vector<128x128xf32>
    %67 = math.absf %61 : vector<128x128xf32>
    %cst_41 = arith.constant 0.000000e+00 : f32
    %68 = vector.broadcast %cst_41 : f32 to vector<128x128xf32>
    %69 = arith.subf %68, %67 : vector<128x128xf32>
    %70 = math.exp %69 : vector<128x128xf32>
    %71 = math.log1p %70 : vector<128x128xf32>
    %72 = arith.addf %66, %71 : vector<128x128xf32>
    %cst_42 = arith.constant 9.99999974E-5 : f32
    %73 = vector.broadcast %cst_42 : f32 to vector<128x128xf32>
    %74 = arith.addf %72, %73 : vector<128x128xf32>
    %75 = arith.select %64, %74, %61 : vector<128x128xi1>, vector<128x128xf32>
    %c0_43 = arith.constant 0 : index
    %c0_44 = arith.constant 0 : index
    %76 = vector.load %arg14[%c0_43, %c0_44] : memref<128x128xf32, #tpu.memory_space<vmem>>, vector<128x128xf32>
    tpu.vector_store %arg14[%c0_43, %c0_44], %75 {strides = array<i32>} : memref<128x128xf32, #tpu.memory_space<vmem>>, vector<128x128xf32>,
    return
  }
  func.func @transform_0(%arg0: i32) -> (i32, i32) {
    %c0_i32 = arith.constant 0 : i32
    %c0_i32_0 = arith.constant 0 : i32
    return %arg0, %c0_i32 : i32, i32
  }
  func.func @transform_1(%arg0: i32) -> (i32, i32) {
    %c0_i32 = arith.constant 0 : i32
    %c0_i32_0 = arith.constant 0 : i32
    %c0_i32_1 = arith.constant 0 : i32
    return %c0_i32, %c0_i32_0 : i32, i32
  }
  func.func @transform_2(%arg0: i32) -> (i32, i32) {
    %c0_i32 = arith.constant 0 : i32
    %c0_i32_0 = arith.constant 0 : i32
    %c0_i32_1 = arith.constant 0 : i32
    return %c0_i32, %c0_i32_0 : i32, i32
  }
  func.func @transform_3(%arg0: i32) -> (i32, i32) {
    %c0_i32 = arith.constant 0 : i32
    %c0_i32_0 = arith.constant 0 : i32
    %c0_i32_1 = arith.constant 0 : i32
    return %c0_i32, %c0_i32_0 : i32, i32
  }
  func.func @transform_4(%arg0: i32) -> (i32, i32) {
    %c0_i32 = arith.constant 0 : i32
    %c0_i32_0 = arith.constant 0 : i32
    %c0_i32_1 = arith.constant 0 : i32
    return %c0_i32, %c0_i32_0 : i32, i32
  }
  func.func @transform_5(%arg0: i32) -> (i32, i32) {
    %c0_i32 = arith.constant 0 : i32
    %c0_i32_0 = arith.constant 0 : i32
    %c0_i32_1 = arith.constant 0 : i32
    return %c0_i32, %c0_i32_0 : i32, i32
  }
  func.func @transform_6(%arg0: i32) -> (i32, i32) {
    %c0_i32 = arith.constant 0 : i32
    %c0_i32_0 = arith.constant 0 : i32
    %c0_i32_1 = arith.constant 0 : i32
    return %c0_i32, %c0_i32_0 : i32, i32
  }
  func.func @transform_7(%arg0: i32) -> (i32, i32) {
    %c0_i32 = arith.constant 0 : i32
    %c0_i32_0 = arith.constant 0 : i32
    %c0_i32_1 = arith.constant 0 : i32
    return %c0_i32, %c0_i32_0 : i32, i32
  }
  func.func @transform_8(%arg0: i32) -> (i32, i32) {
    %c0_i32 = arith.constant 0 : i32
    %c0_i32_0 = arith.constant 0 : i32
    %c0_i32_1 = arith.constant 0 : i32
    return %c0_i32, %c0_i32_0 : i32, i32
  }
  func.func @transform_9(%arg0: i32) -> (i32, i32) {
    %c0_i32 = arith.constant 0 : i32
    %c0_i32_0 = arith.constant 0 : i32
    %c0_i32_1 = arith.constant 0 : i32
    return %c0_i32, %c0_i32_0 : i32, i32
  }
  func.func @transform_10(%arg0: i32) -> (i32, i32) {
    %c0_i32 = arith.constant 0 : i32
    %c0_i32_0 = arith.constant 0 : i32
    %c0_i32_1 = arith.constant 0 : i32
    return %c0_i32, %c0_i32_0 : i32, i32
  }
  func.func @transform_11(%arg0: i32) -> (i32, i32) {
    %c0_i32 = arith.constant 0 : i32
    %c0_i32_0 = arith.constant 0 : i32
    %c0_i32_1 = arith.constant 0 : i32
    return %c0_i32, %c0_i32_0 : i32, i32
  }
  func.func @transform_12(%arg0: i32) -> (i32, i32) {
    %c0_i32 = arith.constant 0 : i32
    %c0_i32_0 = arith.constant 0 : i32
    %c0_i32_1 = arith.constant 0 : i32
    return %c0_i32, %c0_i32_0 : i32, i32
  }
  func.func @transform_13(%arg0: i32) -> (i32, i32) {
    %c0_i32 = arith.constant 0 : i32
    %c0_i32_0 = arith.constant 0 : i32
    return %arg0, %c0_i32 : i32, i32
  }
}

</mosaic_0001>

<bundles_post_ra>
// kernel: simple_mlp_forward.1
= control target key start
LH: loop header
LB: loop body
LE: loop exit
PB: predicated region body
PF: predicated region fallthrough
CT: control target
= control target key end

     0   :  { %18 = vsyncpa [#allocation3], 0  ;;  %s4069_s0 = inlined_call_operand.vmem [shape: f32[128,16], index: 0, kind: input, shape index: {}]   ;;  %s4070_s1 = inlined_call_operand.vmem [shape: bf16[16,256], index: 1, kind: input, shape index: {}]   ;;  %s4071_s2 = inlined_call_operand.vmem [shape: f32[1,256], index: 2, kind: input, shape index: {}]   ;;  %s4072_s3 = inlined_call_operand.vmem [shape: bf16[256,256], index: 3, kind: input, shape index: {}]   ;;  %s4073_s4 = inlined_call_operand.vmem [shape: f32[1,256], index: 4, kind: input, shape index: {}]   ;;  %s4074_s5 = inlined_call_operand.vmem [shape: bf16[256,256], index: 5, kind: input, shape index: {}]   ;;  %s4075_s6 = inlined_call_operand.vmem [shape: f32[1,256], index: 6, kind: input, shape index: {}]   ;;  %s4076_s7 = inlined_call_operand.hbm [shape: bf16[256,256], index: 7, kind: input, shape index: {}]   ;;  %s4077_s8 = inlined_call_operand.vmem [shape: f32[1,256], index: 8, kind: input, shape index: {}]   ;;  %s4078_s9 = inlined_call_operand.hbm [shape: bf16[256,256], index: 9, kind: input, shape index: {}]   ;;  %s4079_s10 = inlined_call_operand.vmem [shape: f32[1,256], index: 10, kind: input, shape index: {}]   ;;  %s4080_s11 = inlined_call_operand.vmem [shape: bf16[256,128], index: 11, kind: input, shape index: {}]   ;;  %s4081_s12 = inlined_call_operand.vmem [shape: f32[1,128], index: 12, kind: input, shape index: {}]   ;;  %s4082_s13 = inlined_call_operand.vmem [shape: f32[128,128], index: 13, kind: output, shape index: {}]  }
   0x1   :  { %19 = vsyncpa [#allocation5], 0  ;;  %s3175_s25 = smov [#allocation2]  }
   0x2   :  { %s39_s26 = sshll.u32 %s3175_s25, 4  ;;  %s40_s26 = int_to_ptr.vmem [resolvable:$true] %s39_s26 }
   0x3   :  { %s3139_s27 = scalar_lea.vmem %s40_s26, 4096  ;;  %p3144_p1 = scmp.lt.s32.totalorder %s40_s26, %s40_s26 }
   0x4   :  { %p3140_p0 = scmp.ne.s32.totalorder %s40_s26, %s3139_s27  ;;  %p3145_p2 = scmp.lt.s32.totalorder %s3139_s27, %s3139_s27 }
   0x6   :  { %p3146_p3 = por %p3145_p2, %p3144_p1 }
   0x8   :  { %p3147_p4 = pnand %p3146_p3, %p3140_p0 }
   0xa   :  { %3150 = shalt.err (!%p3147_p4)
}
   0xb   :  { %s3176_s28 = smov 128   ;;  %s3177_s29 = smov 8  }
   0xc   :  { %45 = dma.hbm_to_vmem [thread:$0]  %s4076_s7, 4096, %s40_s26, [#allocation3], %s3176_s28, %s3176_s28, %s3177_s29  }
   0xd   :  { %s3178_s15 = smov [#allocation4]  }
   0xe   :  { %s53_s16 = sshll.u32 %s3178_s15, 4  ;;  %s54_s16 = int_to_ptr.vmem [resolvable:$true] %s53_s16 }
   0xf   :  { %s3159_s17 = scalar_lea.vmem %s54_s16, 4096  ;;  %p3164_p6 = scmp.lt.s32.totalorder %s54_s16, %s54_s16 }
  0x10   :  { %p3160_p5 = scmp.ne.s32.totalorder %s54_s16, %s3159_s17  ;;  %p3165_p7 = scmp.lt.s32.totalorder %s3159_s17, %s3159_s17 }
  0x12   :  { %p3166_p8 = por %p3165_p7, %p3164_p6 }
  0x14   :  { %p3167_p9 = pnand %p3166_p8, %p3160_p5 }
  0x16   :  { %3170 = shalt.err (!%p3167_p9)
}
  0x17   :  { %59 = dma.hbm_to_vmem [thread:$0]  %s4078_s9, 4096, %s54_s16, [#allocation5], %s3176_s28, %s3176_s28, %s3177_s29  }
  0x18   :  { %3171 = dma.done.wait [#allocation3], 4096  }
  0x19   :  { %3172 = vsyncadd [#allocation3], 4294963200 }
  0x1a   :  { %3173 = dma.done.wait [#allocation5], 4096  }
  0x1b   :  { %3174 = vsyncadd [#allocation5], 4294963200  ;;  %v3179_v0 = vmov 0   ;;  %v2856_v1 = vld [vmem:[%s4070_s1 + $0x4] ss:$8 sps:$4 sm:$0xff]   ;;  %vm121_vm0 = vcmask 130048  }
  0x1c   :  { %178 = vmatprep.mubr.bf16.mxu0 %v3179_v0  ;;  %v2858_v2 = vld [vmem:[%s4070_s1] ss:$8 sps:$4 sm:$0xff]   ;;  %160 = vmatprep.subr.bf16.mxu0 %v2856_v1  ;;  %v75_v6 = vld [vmem:[%s4069_s0 + $0x10] sm:$0xff]  ;;  %v76_v7 = vld [vmem:[%s4069_s0 + $0x18] sm:$0xff] }
  0x1d   :  { %v73_v3 = vld [vmem:[%s4069_s0] sm:$0xff]  ;;  %v74_v4 = vld [vmem:[%s4069_s0 + $0x8] sm:$0xff]  ;;  %161 = vmatpush1.bf16.msra.mxu0 %v2858_v2  ;;  %v2859_v8 = vld [vmem:[%s4072_s3 + $0x74] ss:$8 sps:$4 sm:$0xff]   ;;  %v90_v11 = vpack.c.bf16 %v76_v7, %v75_v6 }
  0x1e   :  { %v89_v5 = vpack.c.bf16 %v74_v4, %v73_v3  ;;  %v2861_v9 = vld [vmem:[%s4072_s3 + $0x70] ss:$8 sps:$4 sm:$0xff]   ;;  %v2862_v10 = vld [vmem:[%s4072_s3 + $0x64] ss:$8 sps:$4 sm:$0xff]   ;;  %575 = vmatprep.subr.bf16.mxu1 %v2859_v8  ;;  %v2864_v12 = vld [vmem:[%s4072_s3 + $0x60] ss:$8 sps:$4 sm:$0xff]  }
  0x1f   :  { %576 = vmatpush1.bf16.msra.mxu1 %v2861_v9  ;;  %v2865_v13 = vld [vmem:[%s4072_s3 + $0x54] ss:$8 sps:$4 sm:$0xff]   ;;  %v77_v14 = vld [vmem:[%s4069_s0 + $0x20] sm:$0xff]  ;;  %v2867_v15 = vld [vmem:[%s4072_s3 + $0x50] ss:$8 sps:$4 sm:$0xff]  }
  0x20   :  { %2618 = vmatmul.mubr.msk.bf16.vlgmr.msra.gmra.mxu0 %vm121_vm0, %v89_v5  ;;  %577 = vmatprep.subr.bf16.mxu1 %v2862_v10  ;;  %v78_v16 = vld [vmem:[%s4069_s0 + $0x28] sm:$0xff]  ;;  %v2871_v20 = vld [vmem:[%s4072_s3 + $0x34] ss:$8 sps:$4 sm:$0xff]   ;;  %v2873_v22 = vld [vmem:[%s4072_s3 + $0x30] ss:$8 sps:$4 sm:$0xff]  }
  0x21   :  { %188 = vmatprep.mubr.bf16.mxu0 %v3179_v0  ;;  %v2868_v17 = vld [vmem:[%s4072_s3 + $0x44] ss:$8 sps:$4 sm:$0xff]   ;;  %v91_v18 = vpack.c.bf16 %v78_v16, %v77_v14  ;;  %v2870_v19 = vld [vmem:[%s4072_s3 + $0x40] ss:$8 sps:$4 sm:$0xff]   ;;  %v79_v21 = vld [vmem:[%s4069_s0 + $0x30] sm:$0xff] }
  0x22   :  { %v80_v23 = vld [vmem:[%s4069_s0 + $0x38] sm:$0xff]  ;;  %v2874_v24 = vld [vmem:[%s4072_s3 + $0x24] ss:$8 sps:$4 sm:$0xff]   ;;  %v2876_v25 = vld [vmem:[%s4072_s3 + $0x20] ss:$8 sps:$4 sm:$0xff]  }
  0x23   :  { %578 = vmatpush1.bf16.msra.mxu1 %v2864_v12  ;;  %v2877_v26 = vld [vmem:[%s4072_s3 + $0x14] ss:$8 sps:$4 sm:$0xff]   ;;  %v92_v27 = vpack.c.bf16 %v80_v23, %v79_v21  ;;  %v2879_v28 = vld [vmem:[%s4072_s3 + $0x10] ss:$8 sps:$4 sm:$0xff]   ;;  %v81_v29 = vld [vmem:[%s4069_s0 + $0x40] sm:$0xff] }
  0x24   :  { %579 = vmatprep.subr.bf16.mxu1 %v2865_v13  ;;  %v82_v30 = vld [vmem:[%s4069_s0 + $0x48] sm:$0xff]  ;;  %v2883_v33 = vld [vmem:[%s4072_s3 + $0xf4] ss:$8 sps:$4 sm:$0xff]   ;;  %v2885_v35 = vld [vmem:[%s4072_s3 + $0xf0] ss:$8 sps:$4 sm:$0xff]  }
  0x25   :  { %v2880_v31 = vld [vmem:[%s4072_s3 + $0x4] ss:$8 sps:$4 sm:$0xff]   ;;  %v2882_v32 = vld [vmem:[%s4072_s3] ss:$8 sps:$4 sm:$0xff]   ;;  %v93_v34 = vpack.c.bf16 %v82_v30, %v81_v29  ;;  %v83_v36 = vld [vmem:[%s4069_s0 + $0x50] sm:$0xff] }
  0x26   :  { %v84_v37 = vld [vmem:[%s4069_s0 + $0x58] sm:$0xff]  ;;  %v2886_v38 = vld [vmem:[%s4072_s3 + $0xe4] ss:$8 sps:$4 sm:$0xff]   ;;  %v2888_v39 = vld [vmem:[%s4072_s3 + $0xe0] ss:$8 sps:$4 sm:$0xff]  }
  0x27   :  { %580 = vmatpush1.bf16.msra.mxu1 %v2867_v15  ;;  %v2889_v40 = vld [vmem:[%s4072_s3 + $0xd4] ss:$8 sps:$4 sm:$0xff]   ;;  %v94_v41 = vpack.c.bf16 %v84_v37, %v83_v36  ;;  %v2891_v42 = vld [vmem:[%s4072_s3 + $0xd0] ss:$8 sps:$4 sm:$0xff]   ;;  %v85_v43 = vld [vmem:[%s4069_s0 + $0x60] sm:$0xff] }
  0x28   :  { %2619 = vmatmul.mubr.msk.bf16.gmra.mxu0 %vm121_vm0, %v90_v11  ;;  %581 = vmatprep.subr.bf16.mxu1 %v2868_v17  ;;  %v86_v44 = vld [vmem:[%s4069_s0 + $0x68] sm:$0xff]  ;;  %v2895_v47 = vld [vmem:[%s4072_s3 + $0xb4] ss:$8 sps:$4 sm:$0xff]   ;;  %v2897_v52 = vld [vmem:[%s4072_s3 + $0xb0] ss:$8 sps:$4 sm:$0xff]  }
  0x29   :  { %198 = vmatprep.mubr.bf16.mxu0 %v3179_v0  ;;  %v2892_v45 = vld [vmem:[%s4072_s3 + $0xc4] ss:$8 sps:$4 sm:$0xff]   ;;  %v2894_v46 = vld [vmem:[%s4072_s3 + $0xc0] ss:$8 sps:$4 sm:$0xff]   ;;  %v95_v48 = vpack.c.bf16 %v86_v44, %v85_v43  ;;  %v87_v49 = vld [vmem:[%s4069_s0 + $0x70] sm:$0xff] }
  0x2a   :  { %v88_v50 = vld [vmem:[%s4069_s0 + $0x78] sm:$0xff]  ;;  %v2898_v53 = vld [vmem:[%s4072_s3 + $0xa4] ss:$8 sps:$4 sm:$0xff]   ;;  %v2900_v54 = vld [vmem:[%s4072_s3 + $0xa0] ss:$8 sps:$4 sm:$0xff]  }
  0x2b   :  { %582 = vmatpush1.bf16.msra.mxu1 %v2870_v19  ;;  %v96_v51 = vpack.c.bf16 %v88_v50, %v87_v49  ;;  %v2901_v55 = vld [vmem:[%s4072_s3 + $0x94] ss:$8 sps:$4 sm:$0xff]   ;;  %v2903_v56 = vld [vmem:[%s4072_s3 + $0x90] ss:$8 sps:$4 sm:$0xff]   ;;  %v2904_v57 = vld [vmem:[%s4072_s3 + $0x84] ss:$8 sps:$4 sm:$0xff]  }
  0x2c   :  { %583 = vmatprep.subr.bf16.mxu1 %v2871_v20  ;;  %v2906_v58 = vld [vmem:[%s4072_s3 + $0x80] ss:$8 sps:$4 sm:$0xff]   ;;  %v2907_v59 = vld [vmem:[%s4074_s5 + $0x70] ss:$8 sps:$4 sm:$0xff]   ;;  %v2909_v60 = vld [vmem:[%s4074_s5 + $0x74] ss:$8 sps:$4 sm:$0xff]   ;;  %v101_v20 = vlaneseq }
  0x2d   :  { %v2912_v61 = vld [vmem:[%s4074_s5 + $0x64] ss:$8 sps:$4 sm:$0xff]   ;;  %1004 = vmatprep.subr.bf16.mxu0 %v2909_v60  ;;  %v2910_v62 = vld [vmem:[%s4074_s5 + $0x60] ss:$8 sps:$4 sm:$0xff]   ;;  %v2915_v63 = vld [vmem:[%s4074_s5 + $0x54] ss:$8 sps:$4 sm:$0xff]  }
  0x2e   :  { %1005 = vmatpush1.bf16.msra.mxu0 %v2907_v59  ;;  %v2918_v1 = vld [vmem:[%s4074_s5 + $0x44] ss:$8 sps:$4 sm:$0xff]   ;;  %v2916_v2 = vld [vmem:[%s4074_s5 + $0x40] ss:$8 sps:$4 sm:$0xff]   ;;  %v2921_v3 = vld [vmem:[%s4074_s5 + $0x34] ss:$8 sps:$4 sm:$0xff]  }
  0x2f   :  { %584 = vmatpush1.bf16.msra.mxu1 %v2873_v22  ;;  %1006 = vmatprep.subr.bf16.mxu0 %v2912_v61  ;;  %v2919_v4 = vld [vmem:[%s4074_s5 + $0x30] ss:$8 sps:$4 sm:$0xff]   ;;  %v2924_v5 = vld [vmem:[%s4074_s5 + $0x24] ss:$8 sps:$4 sm:$0xff]   ;;  %v2922_v6 = vld [vmem:[%s4074_s5 + $0x20] ss:$8 sps:$4 sm:$0xff]  }
  0x30   :  { %2620 = vmatmul.mubr.msk.bf16.gmra.mxu0 %vm121_vm0, %v91_v18  ;;  %585 = vmatprep.subr.bf16.mxu1 %v2874_v24  ;;  %v2927_v7 = vld [vmem:[%s4074_s5 + $0x14] ss:$8 sps:$4 sm:$0xff]   ;;  %v2925_v8 = vld [vmem:[%s4074_s5 + $0x10] ss:$8 sps:$4 sm:$0xff]   ;;  %v2930_v9 = vld [vmem:[%s4074_s5 + $0x4] ss:$8 sps:$4 sm:$0xff]  }
  0x31   :  { %208 = vmatprep.mubr.bf16.mxu0 %v3179_v0  ;;  %v2928_v10 = vld [vmem:[%s4074_s5] ss:$8 sps:$4 sm:$0xff]   ;;  %v2933_v11 = vld [vmem:[%s4074_s5 + $0xf4] ss:$8 sps:$4 sm:$0xff]   ;;  %v2931_v12 = vld [vmem:[%s4074_s5 + $0xf0] ss:$8 sps:$4 sm:$0xff]  }
  0x32   :  { %1007 = vmatpush1.bf16.msra.mxu0 %v2910_v62  ;;  %v2936_v13 = vld [vmem:[%s4074_s5 + $0xe4] ss:$8 sps:$4 sm:$0xff]   ;;  %v2934_v14 = vld [vmem:[%s4074_s5 + $0xe0] ss:$8 sps:$4 sm:$0xff]   ;;  %v2939_v15 = vld [vmem:[%s4074_s5 + $0xd4] ss:$8 sps:$4 sm:$0xff]  }
  0x33   :  { %586 = vmatpush1.bf16.msra.mxu1 %v2876_v25  ;;  %1008 = vmatprep.subr.bf16.mxu0 %v2915_v63  ;;  %v2937_v16 = vld [vmem:[%s4074_s5 + $0xd0] ss:$8 sps:$4 sm:$0xff]   ;;  %v2942_v17 = vld [vmem:[%s4074_s5 + $0xc4] ss:$8 sps:$4 sm:$0xff]   ;;  %v2940_v18 = vld [vmem:[%s4074_s5 + $0xc0] ss:$8 sps:$4 sm:$0xff]  }
  0x34   :  { %587 = vmatprep.subr.bf16.mxu1 %v2877_v26  ;;  %v2945_v19 = vld [vmem:[%s4074_s5 + $0xb4] ss:$8 sps:$4 sm:$0xff]   ;;  %v2943_v21 = vld [vmem:[%s4074_s5 + $0xb0] ss:$8 sps:$4 sm:$0xff]   ;;  %v102_v22 = vshrl.u32 %v101_v20, 7 }
  0x35   :  { %v99_v25 = vld [vmem:[%s4071_s2] sm:$0x3] }
  0x36   :  { %v3501_v23 = vsub.s32 1, %v102_v22  ;;  %v3503_v24 = vsub.s32 0, %v102_v22 }
  0x37   :  { %588 = vmatpush1.bf16.msra.mxu1 %v2879_v28 }
  0x38   :  { %2621 = vmatmul.mubr.msk.bf16.gmra.mxu0 %vm121_vm0, %v92_v27  ;;  %589 = vmatprep.subr.bf16.mxu1 %v2880_v31  ;;  %v3509_v26 = vrot.slane %v99_v25, %v3501_v23  ;;  %v3512_v27 = vrot.slane %v99_v25, %v3503_v24 }
  0x39   :  { %218 = vmatprep.mubr.bf16.mxu0 %v3179_v0 }
  0x3b   :  { %590 = vmatpush1.bf16.msra.mxu1 %v2882_v32 }
  0x3c   :  { %591 = vmatprep.subr.bf16.mxu1 %v2883_v33 }
  0x3f   :  { %592 = vmatpush2.bf16.msra.mxu1 %v2885_v35 }
  0x40   :  { %2622 = vmatmul.mubr.msk.bf16.gmra.mxu0 %vm121_vm0, %v93_v34  ;;  %593 = vmatprep.subr.bf16.mxu1 %v2886_v38 }
  0x41   :  { %228 = vmatprep.mubr.bf16.mxu0 %v3179_v0 }
  0x43   :  { %594 = vmatpush2.bf16.msra.mxu1 %v2888_v39 }
  0x44   :  { %595 = vmatprep.subr.bf16.mxu1 %v2889_v40 }
  0x47   :  { %596 = vmatpush2.bf16.msra.mxu1 %v2891_v42 }
  0x48   :  { %2623 = vmatmul.mubr.msk.bf16.gmra.mxu0 %vm121_vm0, %v94_v41  ;;  %597 = vmatprep.subr.bf16.mxu1 %v2892_v45 }
  0x49   :  { %238 = vmatprep.mubr.bf16.mxu0 %v3179_v0 }
  0x4b   :  { %598 = vmatpush2.bf16.msra.mxu1 %v2894_v46 }
  0x4c   :  { %599 = vmatprep.subr.bf16.mxu1 %v2895_v47 }
  0x4f   :  { %600 = vmatpush2.bf16.msra.mxu1 %v2897_v52 }
  0x50   :  { %2624 = vmatmul.mubr.msk.bf16.gmra.mxu0 %vm121_vm0, %v95_v48  ;;  %601 = vmatprep.subr.bf16.mxu1 %v2898_v53 }
  0x51   :  { %248 = vmatprep.mubr.bf16.mxu0 %v3179_v0  ;;  %v2913_v0 = vld [vmem:[%s4074_s5 + $0x50] ss:$8 sps:$4 sm:$0xff]  }
  0x52   :  { %1009 = vmatpush1.bf16.msra.mxu0 %v2913_v0 }
  0x53   :  { %602 = vmatpush2.bf16.msra.mxu1 %v2900_v54  ;;  %1010 = vmatprep.subr.bf16.mxu0 %v2918_v1 }
  0x54   :  { %603 = vmatprep.subr.bf16.mxu1 %v2901_v55 }
  0x56   :  { %1011 = vmatpush1.bf16.msra.mxu0 %v2916_v2 }
  0x57   :  { %604 = vmatpush2.bf16.msra.mxu1 %v2903_v56  ;;  %1012 = vmatprep.subr.bf16.mxu0 %v2921_v3 }
  0x58   :  { %2625 = vmatmul.mubr.msk.bf16.gmra.mxu0 %vm121_vm0, %v96_v51  ;;  %605 = vmatprep.subr.bf16.mxu1 %v2904_v57 }
  0x5a   :  { %1013 = vmatpush1.bf16.msra.mxu0 %v2919_v4 }
  0x5b   :  { %606 = vmatpush2.bf16.msra.mxu1 %v2906_v58  ;;  %1014 = vmatprep.subr.bf16.mxu0 %v2924_v5 }
  0x5e   :  { %1015 = vmatpush1.bf16.msra.mxu0 %v2922_v6 }
  0x5f   :  { %1016 = vmatprep.subr.bf16.mxu0 %v2927_v7 }
  0x62   :  { %1017 = vmatpush1.bf16.msra.mxu0 %v2925_v8 }
  0x63   :  { %1018 = vmatprep.subr.bf16.mxu0 %v2930_v9 }
  0x66   :  { %1019 = vmatpush1.bf16.msra.mxu0 %v2928_v10 }
  0x67   :  { %1020 = vmatprep.subr.bf16.mxu0 %v2933_v11 }
  0x6a   :  { %1021 = vmatpush2.bf16.msra.mxu0 %v2931_v12 }
  0x6b   :  { %1022 = vmatprep.subr.bf16.mxu0 %v2936_v13 }
  0x6e   :  { %1023 = vmatpush2.bf16.msra.mxu0 %v2934_v14 }
  0x6f   :  { %1024 = vmatprep.subr.bf16.mxu0 %v2939_v15 }
  0x72   :  { %1025 = vmatpush2.bf16.msra.mxu0 %v2937_v16 }
  0x73   :  { %1026 = vmatprep.subr.bf16.mxu0 %v2942_v17 }
  0x76   :  { %1027 = vmatpush2.bf16.msra.mxu0 %v2940_v18 }
  0x77   :  { %1028 = vmatprep.subr.bf16.mxu0 %v2945_v19 }
  0x7a   :  { %1029 = vmatpush2.bf16.msra.mxu0 %v2943_v21 }
  0xe0   :  { %v180_v28 = vpop.f32.mrf.mxu0 }
  0xe1   :  { %v181_v31 = vadd.f32 %v180_v28, %v3512_v27 }
  0xe2   :  { %v182_v29 = vpop.f32.mrf.mxu0 }
  0xe3   :  { %v183_v30 = vadd.f32 %v182_v29, %v3509_v26  ;;  %v291_v38 = vmul.f32 0.01, %v181_v31  ;;  %vm259_vm3 = vcmp.gt.f32.partialorder %v181_v31, 0.0 }
  0xe4   :  { %v184_v32 = vpop.f32.mrf.mxu0 }
  0xe5   :  { %v185_v33 = vadd.f32 %v184_v32, %v3512_v27  ;;  %v292_v35 = vmul.f32 0.01, %v183_v30  ;;  %vm260_vm2 = vcmp.gt.f32.partialorder %v183_v30, 0.0  ;;  %v323_v49 = vsel %vm259_vm3, %v181_v31, %v291_v38 }
  0xe6   :  { %v186_v34 = vpop.f32.mrf.mxu0 }
  0xe7   :  { %vm261_vm1 = vcmp.gt.f32.partialorder %v185_v33, 0.0  ;;  %v293_v36 = vmul.f32 0.01, %v185_v33  ;;  %v187_v37 = vadd.f32 %v186_v34, %v3509_v26  ;;  %v324_v44 = vsel %vm260_vm2, %v183_v30, %v292_v35 }
  0xe8   :  { %v190_v39 = vpop.f32.mrf.mxu0 }
  0xe9   :  { %v294_v40 = vmul.f32 0.01, %v187_v37  ;;  %vm262_vm4 = vcmp.gt.f32.partialorder %v187_v37, 0.0  ;;  %v325_v42 = vsel %vm261_vm1, %v185_v33, %v293_v36  ;;  %v191_v46 = vadd.f32 %v190_v39, %v3512_v27 }
  0xea   :  { %v192_v41 = vpop.f32.mrf.mxu0  ;;  %v355_v51 = vpack.c.bf16 %v325_v42, %v323_v49 }
  0xeb   :  { %v193_v43 = vadd.f32 %v192_v41, %v3509_v26  ;;  %v326_v45 = vsel %vm262_vm4, %v187_v37, %v294_v40  ;;  %v295_v56 = vmul.f32 0.01, %v191_v46  ;;  %vm263_vm7 = vcmp.gt.f32.partialorder %v191_v46, 0.0 }
  0xec   :  { %v194_v47 = vpop.f32.mrf.mxu0  ;;  %v356_v48 = vpack.c.bf16 %v326_v45, %v324_v44 }
  0xed   :  { %v195_v50 = vadd.f32 %v194_v47, %v3512_v27  ;;  %v296_v53 = vmul.f32 0.01, %v193_v43  ;;  %vm264_vm6 = vcmp.gt.f32.partialorder %v193_v43, 0.0  ;;  %v327_v3 = vsel %vm263_vm7, %v191_v46, %v295_v56 }
  0xee   :  { %v196_v52 = vpop.f32.mrf.mxu0  ;;  %607 = vmatprep.mubr.bf16.mxu1 %v356_v48 }
  0xef   :  { %vm265_vm5 = vcmp.gt.f32.partialorder %v195_v50, 0.0  ;;  %v297_v54 = vmul.f32 0.01, %v195_v50  ;;  %v197_v55 = vadd.f32 %v196_v52, %v3509_v26  ;;  %608 = vmatmul.mubr.bf16.vlgmr.msra.gmra.mxu1 %v355_v51  ;;  %v328_v62 = vsel %vm264_vm6, %v193_v43, %v296_v53 }
  0xf0   :  { %v200_v57 = vpop.f32.mrf.mxu0 }
  0xf1   :  { %vm266_vm8 = vcmp.gt.f32.partialorder %v197_v55, 0.0  ;;  %v298_v58 = vmul.f32 0.01, %v197_v55  ;;  %v329_v60 = vsel %vm265_vm5, %v195_v50, %v297_v54  ;;  %v201_v0 = vadd.f32 %v200_v57, %v3512_v27 }
  0xf2   :  { %v202_v59 = vpop.f32.mrf.mxu0  ;;  %v357_v5 = vpack.c.bf16 %v329_v60, %v327_v3 }
  0xf3   :  { %v203_v61 = vadd.f32 %v202_v59, %v3509_v26  ;;  %v330_v63 = vsel %vm266_vm8, %v197_v55, %v298_v58  ;;  %v299_v10 = vmul.f32 0.01, %v201_v0  ;;  %vm267_vm11 = vcmp.gt.f32.partialorder %v201_v0, 0.0 }
  0xf4   :  { %v204_v1 = vpop.f32.mrf.mxu0  ;;  %v358_v2 = vpack.c.bf16 %v330_v63, %v328_v62 }
  0xf5   :  { %v205_v4 = vadd.f32 %v204_v1, %v3512_v27  ;;  %v300_v7 = vmul.f32 0.01, %v203_v61  ;;  %vm268_vm10 = vcmp.gt.f32.partialorder %v203_v61, 0.0  ;;  %v331_v22 = vsel %vm267_vm11, %v201_v0, %v299_v10 }
  0xf6   :  { %v206_v6 = vpop.f32.mrf.mxu0  ;;  %617 = vmatprep.mubr.bf16.mxu1 %v358_v2 }
  0xf7   :  { %vm269_vm9 = vcmp.gt.f32.partialorder %v205_v4, 0.0  ;;  %v301_v8 = vmul.f32 0.01, %v205_v4  ;;  %v207_v9 = vadd.f32 %v206_v6, %v3509_v26  ;;  %618 = vmatmul.mubr.bf16.gmra.mxu1 %v357_v5  ;;  %v332_v16 = vsel %vm268_vm10, %v203_v61, %v300_v7 }
  0xf8   :  { %v210_v11 = vpop.f32.mrf.mxu0 }
  0xf9   :  { %vm270_vm12 = vcmp.gt.f32.partialorder %v207_v9, 0.0  ;;  %v302_v12 = vmul.f32 0.01, %v207_v9  ;;  %v333_v14 = vsel %vm269_vm9, %v205_v4, %v301_v8  ;;  %v211_v18 = vadd.f32 %v210_v11, %v3512_v27 }
  0xfa   :  { %v212_v13 = vpop.f32.mrf.mxu0  ;;  %v359_v28 = vpack.c.bf16 %v333_v14, %v331_v22 }
  0xfb   :  { %v213_v15 = vadd.f32 %v212_v13, %v3509_v26  ;;  %v334_v17 = vsel %vm270_vm12, %v207_v9, %v302_v12  ;;  %v303_v33 = vmul.f32 0.01, %v211_v18  ;;  %vm271_vm15 = vcmp.gt.f32.partialorder %v211_v18, 0.0 }
  0xfc   :  { %v214_v19 = vpop.f32.mrf.mxu0  ;;  %v360_v21 = vpack.c.bf16 %v334_v17, %v332_v16 }
  0xfd   :  { %v215_v25 = vadd.f32 %v214_v19, %v3512_v27  ;;  %v304_v30 = vmul.f32 0.01, %v213_v15  ;;  %vm272_vm14 = vcmp.gt.f32.partialorder %v213_v15, 0.0  ;;  %v335_v44 = vsel %vm271_vm15, %v211_v18, %v303_v33 }
  0xfe   :  { %v216_v29 = vpop.f32.mrf.mxu0  ;;  %627 = vmatprep.mubr.bf16.mxu1 %v360_v21 }
  0xff   :  { %vm273_vm13 = vcmp.gt.f32.partialorder %v215_v25, 0.0  ;;  %v305_v31 = vmul.f32 0.01, %v215_v25  ;;  %v217_v32 = vadd.f32 %v216_v29, %v3509_v26  ;;  %628 = vmatmul.mubr.bf16.gmra.mxu1 %v359_v28  ;;  %v336_v39 = vsel %vm272_vm14, %v213_v15, %v304_v30 }
 0x100   :  { %v220_v34 = vpop.f32.mrf.mxu0 }
 0x101   :  { %vm274_vm0 = vcmp.gt.f32.partialorder %v217_v32, 0.0  ;;  %v306_v35 = vmul.f32 0.01, %v217_v32  ;;  %v337_v37 = vsel %vm273_vm13, %v215_v25, %v305_v31  ;;  %v221_v41 = vadd.f32 %v220_v34, %v3512_v27 }
 0x102   :  { %v222_v36 = vpop.f32.mrf.mxu0  ;;  %v361_v46 = vpack.c.bf16 %v337_v37, %v335_v44 }
 0x103   :  { %v223_v38 = vadd.f32 %v222_v36, %v3509_v26  ;;  %v338_v40 = vsel %vm274_vm0, %v217_v32, %v306_v35  ;;  %v307_v51 = vmul.f32 0.01, %v221_v41  ;;  %vm275_vm3 = vcmp.gt.f32.partialorder %v221_v41, 0.0 }
 0x104   :  { %v224_v42 = vpop.f32.mrf.mxu0  ;;  %v362_v43 = vpack.c.bf16 %v338_v40, %v336_v39 }
 0x105   :  { %v225_v45 = vadd.f32 %v224_v42, %v3512_v27  ;;  %v308_v48 = vmul.f32 0.01, %v223_v38  ;;  %vm276_vm2 = vcmp.gt.f32.partialorder %v223_v38, 0.0  ;;  %v339_v62 = vsel %vm275_vm3, %v221_v41, %v307_v51 }
 0x106   :  { %v226_v47 = vpop.f32.mrf.mxu0  ;;  %637 = vmatprep.mubr.bf16.mxu1 %v362_v43 }
 0x107   :  { %vm277_vm1 = vcmp.gt.f32.partialorder %v225_v45, 0.0  ;;  %v309_v49 = vmul.f32 0.01, %v225_v45  ;;  %v227_v50 = vadd.f32 %v226_v47, %v3509_v26  ;;  %638 = vmatmul.mubr.bf16.gmra.mxu1 %v361_v46  ;;  %v340_v57 = vsel %vm276_vm2, %v223_v38, %v308_v48 }
 0x108   :  { %v230_v52 = vpop.f32.mrf.mxu0 }
 0x109   :  { %vm278_vm4 = vcmp.gt.f32.partialorder %v227_v50, 0.0  ;;  %v310_v53 = vmul.f32 0.01, %v227_v50  ;;  %v341_v55 = vsel %vm277_vm1, %v225_v45, %v309_v49  ;;  %v231_v59 = vadd.f32 %v230_v52, %v3512_v27 }
 0x10a   :  { %v232_v54 = vpop.f32.mrf.mxu0  ;;  %v363_v0 = vpack.c.bf16 %v341_v55, %v339_v62  ;;  %v2949_v55 = vld [vmem:[%s4074_s5 + $0x90] ss:$8 sps:$4 sm:$0xff]   ;;  %v2963_v62 = vld [vmem:[#allocation2 + $0x54] ss:$8 sps:$4 sm:$0xff]  }
 0x10b   :  { %v233_v56 = vadd.f32 %v232_v54, %v3509_v26  ;;  %v342_v58 = vsel %vm278_vm4, %v227_v50, %v310_v53  ;;  %v311_v5 = vmul.f32 0.01, %v231_v59  ;;  %vm279_vm7 = vcmp.gt.f32.partialorder %v231_v59, 0.0  ;;  %v2948_v53 = vld [vmem:[%s4074_s5 + $0xa4] ss:$8 sps:$4 sm:$0xff]  }
 0x10c   :  { %v234_v60 = vpop.f32.mrf.mxu0  ;;  %v364_v61 = vpack.c.bf16 %v342_v58, %v340_v57  ;;  %1030 = vmatprep.subr.bf16.mxu0 %v2948_v53  ;;  %v2951_v54 = vld [vmem:[%s4074_s5 + $0x94] ss:$8 sps:$4 sm:$0xff]   ;;  %v2952_v57 = vld [vmem:[%s4074_s5 + $0x80] ss:$8 sps:$4 sm:$0xff]   ;;  %v2955_v58 = vld [vmem:[#allocation2 + $0x70] ss:$8 sps:$4 sm:$0xff]  }
 0x10d   :  { %v235_v63 = vadd.f32 %v234_v60, %v3512_v27  ;;  %v312_v2 = vmul.f32 0.01, %v233_v56  ;;  %vm280_vm6 = vcmp.gt.f32.partialorder %v233_v56, 0.0  ;;  %v343_v16 = vsel %vm279_vm7, %v231_v59, %v311_v5  ;;  %v2957_v59 = vld [vmem:[#allocation2 + $0x74] ss:$8 sps:$4 sm:$0xff]  }
 0x10e   :  { %v236_v1 = vpop.f32.mrf.mxu0  ;;  %647 = vmatprep.mubr.bf16.mxu1 %v364_v61  ;;  %v2960_v60 = vld [vmem:[#allocation2 + $0x64] ss:$8 sps:$4 sm:$0xff]   ;;  %1433 = vmatprep.subr.bf16.mxu1 %v2957_v59  ;;  %v2958_v61 = vld [vmem:[#allocation2 + $0x60] ss:$8 sps:$4 sm:$0xff]  }
 0x10f   :  { %vm281_vm5 = vcmp.gt.f32.partialorder %v235_v63, 0.0  ;;  %v313_v3 = vmul.f32 0.01, %v235_v63  ;;  %v237_v4 = vadd.f32 %v236_v1, %v3509_v26  ;;  %648 = vmatmul.mubr.bf16.gmra.mxu1 %v363_v0  ;;  %v344_v11 = vsel %vm280_vm6, %v233_v56, %v312_v2  ;;  %v2954_v56 = vld [vmem:[%s4074_s5 + $0x84] ss:$8 sps:$4 sm:$0xff]  }
 0x110   :  { %v240_v6 = vpop.f32.mrf.mxu0  ;;  %1434 = vmatpush1.bf16.msra.mxu1 %v2955_v58  ;;  %v2966_v0 = vld [vmem:[#allocation2 + $0x44] ss:$8 sps:$4 sm:$0xff]   ;;  %v2964_v1 = vld [vmem:[#allocation2 + $0x40] ss:$8 sps:$4 sm:$0xff]   ;;  %v2969_v2 = vld [vmem:[#allocation2 + $0x34] ss:$8 sps:$4 sm:$0xff]  }
 0x111   :  { %vm282_vm8 = vcmp.gt.f32.partialorder %v237_v4, 0.0  ;;  %v314_v7 = vmul.f32 0.01, %v237_v4  ;;  %v345_v9 = vsel %vm281_vm5, %v235_v63, %v313_v3  ;;  %v241_v13 = vadd.f32 %v240_v6, %v3512_v27  ;;  %1435 = vmatprep.subr.bf16.mxu1 %v2960_v60  ;;  %v2961_v63 = vld [vmem:[#allocation2 + $0x50] ss:$8 sps:$4 sm:$0xff]  }
 0x112   :  { %v242_v8 = vpop.f32.mrf.mxu0  ;;  %v365_v18 = vpack.c.bf16 %v345_v9, %v343_v16  ;;  %v2967_v3 = vld [vmem:[#allocation2 + $0x30] ss:$8 sps:$4 sm:$0xff]   ;;  %v2970_v5 = vld [vmem:[#allocation2 + $0x20] ss:$8 sps:$4 sm:$0xff]   ;;  %v2975_v6 = vld [vmem:[#allocation2 + $0x14] ss:$8 sps:$4 sm:$0xff]  }
 0x113   :  { %v243_v10 = vadd.f32 %v242_v8, %v3509_v26  ;;  %v346_v12 = vsel %vm282_vm8, %v237_v4, %v314_v7  ;;  %v315_v28 = vmul.f32 0.01, %v241_v13  ;;  %vm283_vm11 = vcmp.gt.f32.partialorder %v241_v13, 0.0  ;;  %v2972_v4 = vld [vmem:[#allocation2 + $0x24] ss:$8 sps:$4 sm:$0xff]  }
 0x114   :  { %v244_v14 = vpop.f32.mrf.mxu0  ;;  %v366_v15 = vpack.c.bf16 %v346_v12, %v344_v11  ;;  %1436 = vmatpush1.bf16.msra.mxu1 %v2958_v61  ;;  %v2973_v7 = vld [vmem:[#allocation2 + $0x10] ss:$8 sps:$4 sm:$0xff]   ;;  %v2978_v8 = vld [vmem:[#allocation2 + $0x4] ss:$8 sps:$4 sm:$0xff]   ;;  %v2976_v9 = vld [vmem:[#allocation2] ss:$8 sps:$4 sm:$0xff]  }
 0x115   :  { %v245_v17 = vadd.f32 %v244_v14, %v3512_v27  ;;  %v316_v21 = vmul.f32 0.01, %v243_v10  ;;  %vm284_vm10 = vcmp.gt.f32.partialorder %v243_v10, 0.0  ;;  %v347_v39 = vsel %vm283_vm11, %v241_v13, %v315_v28  ;;  %1437 = vmatprep.subr.bf16.mxu1 %v2963_v62  ;;  %v2979_v11 = vld [vmem:[#allocation2 + $0xf0] ss:$8 sps:$4 sm:$0xff]  }
 0x116   :  { %v246_v19 = vpop.f32.mrf.mxu0  ;;  %657 = vmatprep.mubr.bf16.mxu1 %v366_v15  ;;  %v2984_v12 = vld [vmem:[#allocation2 + $0xe4] ss:$8 sps:$4 sm:$0xff]   ;;  %v2982_v13 = vld [vmem:[#allocation2 + $0xe0] ss:$8 sps:$4 sm:$0xff]   ;;  %v2987_v14 = vld [vmem:[#allocation2 + $0xd4] ss:$8 sps:$4 sm:$0xff]  }
 0x117   :  { %vm285_vm9 = vcmp.gt.f32.partialorder %v245_v17, 0.0  ;;  %v317_v22 = vmul.f32 0.01, %v245_v17  ;;  %v247_v25 = vadd.f32 %v246_v19, %v3509_v26  ;;  %658 = vmatmul.mubr.bf16.gmra.mxu1 %v365_v18  ;;  %v348_v34 = vsel %vm284_vm10, %v243_v10, %v316_v21  ;;  %v2981_v10 = vld [vmem:[#allocation2 + $0xf4] ss:$8 sps:$4 sm:$0xff]  }
 0x118   :  { %v250_v29 = vpop.f32.mrf.mxu0  ;;  %1438 = vmatpush1.bf16.msra.mxu1 %v2961_v63  ;;  %v2985_v15 = vld [vmem:[#allocation2 + $0xd0] ss:$8 sps:$4 sm:$0xff]   ;;  %v2990_v16 = vld [vmem:[#allocation2 + $0xc4] ss:$8 sps:$4 sm:$0xff]   ;;  %v2993_v18 = vld [vmem:[#allocation2 + $0xb4] ss:$8 sps:$4 sm:$0xff]  }
 0x119   :  { %vm286_vm12 = vcmp.gt.f32.partialorder %v247_v25, 0.0  ;;  %v318_v30 = vmul.f32 0.01, %v247_v25  ;;  %v349_v32 = vsel %vm285_vm9, %v245_v17, %v317_v22  ;;  %v251_v36 = vadd.f32 %v250_v29, %v3512_v27  ;;  %1439 = vmatprep.subr.bf16.mxu1 %v2966_v0  ;;  %v2988_v17 = vld [vmem:[#allocation2 + $0xc0] ss:$8 sps:$4 sm:$0xff]  }
 0x11a   :  { %v252_v31 = vpop.f32.mrf.mxu0  ;;  %v367_v41 = vpack.c.bf16 %v349_v32, %v347_v39  ;;  %v2991_v19 = vld [vmem:[#allocation2 + $0xb0] ss:$8 sps:$4 sm:$0xff]   ;;  %v403_v21 = vld [vmem:[%s4073_s4] sm:$0x3] }
 0x11b   :  { %v253_v33 = vadd.f32 %v252_v31, %v3509_v26  ;;  %v350_v35 = vsel %vm286_vm12, %v247_v25, %v318_v30  ;;  %v319_v46 = vmul.f32 0.01, %v251_v36  ;;  %vm287_vm15 = vcmp.gt.f32.partialorder %v251_v36, 0.0 }
 0x11c   :  { %v254_v37 = vpop.f32.mrf.mxu0  ;;  %v368_v38 = vpack.c.bf16 %v350_v35, %v348_v34  ;;  %1440 = vmatpush1.bf16.msra.mxu1 %v2964_v1  ;;  %v3568_v22 = vrot.slane %v403_v21, %v3501_v23  ;;  %v3571_v25 = vrot.slane %v403_v21, %v3503_v24 }
 0x11d   :  { %v255_v40 = vadd.f32 %v254_v37, %v3512_v27  ;;  %v320_v43 = vmul.f32 0.01, %v253_v33  ;;  %vm288_vm14 = vcmp.gt.f32.partialorder %v253_v33, 0.0  ;;  %v351_v52 = vsel %vm287_vm15, %v251_v36, %v319_v46  ;;  %1441 = vmatprep.subr.bf16.mxu1 %v2969_v2 }
 0x11e   :  { %v256_v42 = vpop.f32.mrf.mxu0  ;;  %667 = vmatprep.mubr.bf16.mxu1 %v368_v38 }
 0x11f   :  { %vm289_vm13 = vcmp.gt.f32.partialorder %v255_v40, 0.0  ;;  %v321_v44 = vmul.f32 0.01, %v255_v40  ;;  %v257_v45 = vadd.f32 %v256_v42, %v3509_v26  ;;  %668 = vmatmul.mubr.bf16.gmra.mxu1 %v367_v41  ;;  %v352_v49 = vsel %vm288_vm14, %v253_v33, %v320_v43  ;;  %v2946_v26 = vld [vmem:[%s4074_s5 + $0xa0] ss:$8 sps:$4 sm:$0xff]  }
 0x120   :  { %1031 = vmatpush2.bf16.msra.mxu0 %v2946_v26  ;;  %1442 = vmatpush1.bf16.msra.mxu1 %v2967_v3 }
 0x121   :  { %vm290_vm0 = vcmp.gt.f32.partialorder %v257_v45, 0.0  ;;  %v322_v47 = vmul.f32 0.01, %v257_v45  ;;  %v353_v48 = vsel %vm289_vm13, %v255_v40, %v321_v44  ;;  %1032 = vmatprep.subr.bf16.mxu0 %v2951_v54  ;;  %1443 = vmatprep.subr.bf16.mxu1 %v2972_v4 }
 0x122   :  { %v369_v27 = vpack.c.bf16 %v353_v48, %v351_v52 }
 0x123   :  { %v354_v50 = vsel %vm290_vm0, %v257_v45, %v322_v47 }
 0x124   :  { %v370_v51 = vpack.c.bf16 %v354_v50, %v352_v49  ;;  %1033 = vmatpush2.bf16.msra.mxu0 %v2949_v55  ;;  %1444 = vmatpush1.bf16.msra.mxu1 %v2970_v5 }
 0x125   :  { %1034 = vmatprep.subr.bf16.mxu0 %v2954_v56  ;;  %1445 = vmatprep.subr.bf16.mxu1 %v2975_v6 }
 0x126   :  { %677 = vmatprep.mubr.bf16.mxu1 %v370_v51 }
 0x127   :  { %678 = vmatmul.mubr.bf16.gmra.mxu1 %v369_v27 }
 0x128   :  { %1035 = vmatpush2.bf16.msra.mxu0 %v2952_v57  ;;  %1446 = vmatpush1.bf16.msra.mxu1 %v2973_v7 }
 0x129   :  { %1447 = vmatprep.subr.bf16.mxu1 %v2978_v8 }
 0x12c   :  { %1448 = vmatpush1.bf16.msra.mxu1 %v2976_v9 }
 0x12d   :  { %1449 = vmatprep.subr.bf16.mxu1 %v2981_v10 }
 0x130   :  { %1450 = vmatpush2.bf16.msra.mxu1 %v2979_v11 }
 0x131   :  { %1451 = vmatprep.subr.bf16.mxu1 %v2984_v12 }
 0x134   :  { %1452 = vmatpush2.bf16.msra.mxu1 %v2982_v13 }
 0x135   :  { %1453 = vmatprep.subr.bf16.mxu1 %v2987_v14 }
 0x138   :  { %1454 = vmatpush2.bf16.msra.mxu1 %v2985_v15 }
 0x139   :  { %1455 = vmatprep.subr.bf16.mxu1 %v2990_v16 }
 0x13c   :  { %1456 = vmatpush2.bf16.msra.mxu1 %v2988_v17 }
 0x13d   :  { %1457 = vmatprep.subr.bf16.mxu1 %v2993_v18 }
 0x140   :  { %1458 = vmatpush2.bf16.msra.mxu1 %v2991_v19 }
 0x1af   :  { %v609_v28 = vpop.f32.mrf.mxu1 }
 0x1b0   :  { %v610_v31 = vadd.f32 %v609_v28, %v3571_v25 }
 0x1b1   :  { %v611_v29 = vpop.f32.mrf.mxu1 }
 0x1b2   :  { %v612_v30 = vadd.f32 %v611_v29, %v3568_v22  ;;  %v720_v38 = vmul.f32 0.01, %v610_v31  ;;  %vm688_vm3 = vcmp.gt.f32.partialorder %v610_v31, 0.0 }
 0x1b3   :  { %v613_v32 = vpop.f32.mrf.mxu1 }
 0x1b4   :  { %v614_v33 = vadd.f32 %v613_v32, %v3571_v25  ;;  %v721_v35 = vmul.f32 0.01, %v612_v30  ;;  %vm689_vm2 = vcmp.gt.f32.partialorder %v612_v30, 0.0  ;;  %v752_v46 = vsel %vm688_vm3, %v610_v31, %v720_v38 }
 0x1b5   :  { %v615_v34 = vpop.f32.mrf.mxu1 }
 0x1b6   :  { %vm690_vm1 = vcmp.gt.f32.partialorder %v614_v33, 0.0  ;;  %v722_v36 = vmul.f32 0.01, %v614_v33  ;;  %v616_v37 = vadd.f32 %v615_v34, %v3568_v22  ;;  %v753_v44 = vsel %vm689_vm2, %v612_v30, %v721_v35 }
 0x1b7   :  { %v619_v39 = vpop.f32.mrf.mxu1 }
 0x1b8   :  { %vm691_vm4 = vcmp.gt.f32.partialorder %v616_v37, 0.0  ;;  %v723_v40 = vmul.f32 0.01, %v616_v37  ;;  %v754_v41 = vsel %vm690_vm1, %v614_v33, %v722_v36  ;;  %v620_v47 = vadd.f32 %v619_v39, %v3571_v25 }
 0x1b9   :  { %v621_v42 = vpop.f32.mrf.mxu1  ;;  %v784_v50 = vpack.c.bf16 %v754_v41, %v752_v46 }
 0x1ba   :  { %v622_v43 = vadd.f32 %v621_v42, %v3568_v22  ;;  %v755_v45 = vsel %vm691_vm4, %v616_v37, %v723_v40  ;;  %v724_v54 = vmul.f32 0.01, %v620_v47  ;;  %vm692_vm7 = vcmp.gt.f32.partialorder %v620_v47, 0.0 }
 0x1bb   :  { %v623_v48 = vpop.f32.mrf.mxu1  ;;  %v785_v49 = vpack.c.bf16 %v755_v45, %v753_v44 }
 0x1bc   :  { %v624_v51 = vadd.f32 %v623_v48, %v3571_v25  ;;  %v725_v27 = vmul.f32 0.01, %v622_v43  ;;  %vm693_vm6 = vcmp.gt.f32.partialorder %v622_v43, 0.0  ;;  %v756_v1 = vsel %vm692_vm7, %v620_v47, %v724_v54 }
 0x1bd   :  { %v625_v52 = vpop.f32.mrf.mxu1  ;;  %1036 = vmatprep.mubr.bf16.mxu0 %v785_v49 }
 0x1be   :  { %vm694_vm5 = vcmp.gt.f32.partialorder %v624_v51, 0.0  ;;  %v726_v53 = vmul.f32 0.01, %v624_v51  ;;  %v626_v26 = vadd.f32 %v625_v52, %v3568_v22  ;;  %1037 = vmatmul.mubr.bf16.vlgmr.msra.gmra.mxu0 %v784_v50  ;;  %v757_v60 = vsel %vm693_vm6, %v622_v43, %v725_v27 }
 0x1bf   :  { %v629_v55 = vpop.f32.mrf.mxu1 }
 0x1c0   :  { %vm695_vm8 = vcmp.gt.f32.partialorder %v626_v26, 0.0  ;;  %v727_v56 = vmul.f32 0.01, %v626_v26  ;;  %v758_v58 = vsel %vm694_vm5, %v624_v51, %v726_v53  ;;  %v630_v62 = vadd.f32 %v629_v55, %v3571_v25 }
 0x1c1   :  { %v631_v57 = vpop.f32.mrf.mxu1  ;;  %v786_v3 = vpack.c.bf16 %v758_v58, %v756_v1 }
 0x1c2   :  { %v632_v59 = vadd.f32 %v631_v57, %v3568_v22  ;;  %v759_v61 = vsel %vm695_vm8, %v626_v26, %v727_v56  ;;  %v728_v8 = vmul.f32 0.01, %v630_v62  ;;  %vm696_vm11 = vcmp.gt.f32.partialorder %v630_v62, 0.0 }
 0x1c3   :  { %v633_v63 = vpop.f32.mrf.mxu1  ;;  %v787_v0 = vpack.c.bf16 %v759_v61, %v757_v60 }
 0x1c4   :  { %v634_v2 = vadd.f32 %v633_v63, %v3571_v25  ;;  %v729_v5 = vmul.f32 0.01, %v632_v59  ;;  %vm697_vm10 = vcmp.gt.f32.partialorder %v632_v59, 0.0  ;;  %v760_v19 = vsel %vm696_vm11, %v630_v62, %v728_v8 }
 0x1c5   :  { %v635_v4 = vpop.f32.mrf.mxu1  ;;  %1046 = vmatprep.mubr.bf16.mxu0 %v787_v0 }
 0x1c6   :  { %vm698_vm9 = vcmp.gt.f32.partialorder %v634_v2, 0.0  ;;  %v730_v6 = vmul.f32 0.01, %v634_v2  ;;  %v636_v7 = vadd.f32 %v635_v4, %v3568_v22  ;;  %1047 = vmatmul.mubr.bf16.gmra.mxu0 %v786_v3  ;;  %v761_v14 = vsel %vm697_vm10, %v632_v59, %v729_v5 }
 0x1c7   :  { %v639_v9 = vpop.f32.mrf.mxu1 }
 0x1c8   :  { %vm699_vm12 = vcmp.gt.f32.partialorder %v636_v7, 0.0  ;;  %v731_v10 = vmul.f32 0.01, %v636_v7  ;;  %v762_v12 = vsel %vm698_vm9, %v634_v2, %v730_v6  ;;  %v640_v16 = vadd.f32 %v639_v9, %v3571_v25 }
 0x1c9   :  { %v641_v11 = vpop.f32.mrf.mxu1  ;;  %v788_v28 = vpack.c.bf16 %v762_v12, %v760_v19 }
 0x1ca   :  { %v642_v13 = vadd.f32 %v641_v11, %v3568_v22  ;;  %v763_v15 = vsel %vm699_vm12, %v636_v7, %v731_v10  ;;  %v732_v33 = vmul.f32 0.01, %v640_v16  ;;  %vm700_vm15 = vcmp.gt.f32.partialorder %v640_v16, 0.0 }
 0x1cb   :  { %v643_v17 = vpop.f32.mrf.mxu1  ;;  %v789_v18 = vpack.c.bf16 %v763_v15, %v761_v14 }
 0x1cc   :  { %v644_v21 = vadd.f32 %v643_v17, %v3571_v25  ;;  %v733_v30 = vmul.f32 0.01, %v642_v13  ;;  %vm701_vm14 = vcmp.gt.f32.partialorder %v642_v13, 0.0  ;;  %v764_v44 = vsel %vm700_vm15, %v640_v16, %v732_v33 }
 0x1cd   :  { %v645_v29 = vpop.f32.mrf.mxu1  ;;  %1056 = vmatprep.mubr.bf16.mxu0 %v789_v18 }
 0x1ce   :  { %vm702_vm13 = vcmp.gt.f32.partialorder %v644_v21, 0.0  ;;  %v734_v31 = vmul.f32 0.01, %v644_v21  ;;  %v646_v32 = vadd.f32 %v645_v29, %v3568_v22  ;;  %1057 = vmatmul.mubr.bf16.gmra.mxu0 %v788_v28  ;;  %v765_v39 = vsel %vm701_vm14, %v642_v13, %v733_v30 }
 0x1cf   :  { %v649_v34 = vpop.f32.mrf.mxu1 }
 0x1d0   :  { %vm703_vm0 = vcmp.gt.f32.partialorder %v646_v32, 0.0  ;;  %v735_v35 = vmul.f32 0.01, %v646_v32  ;;  %v766_v37 = vsel %vm702_vm13, %v644_v21, %v734_v31  ;;  %v650_v41 = vadd.f32 %v649_v34, %v3571_v25 }
 0x1d1   :  { %v651_v36 = vpop.f32.mrf.mxu1  ;;  %v790_v46 = vpack.c.bf16 %v766_v37, %v764_v44 }
 0x1d2   :  { %v652_v38 = vadd.f32 %v651_v36, %v3568_v22  ;;  %v767_v40 = vsel %vm703_vm0, %v646_v32, %v735_v35  ;;  %v736_v51 = vmul.f32 0.01, %v650_v41  ;;  %vm704_vm3 = vcmp.gt.f32.partialorder %v650_v41, 0.0 }
 0x1d3   :  { %v653_v42 = vpop.f32.mrf.mxu1  ;;  %v791_v43 = vpack.c.bf16 %v767_v40, %v765_v39 }
 0x1d4   :  { %v654_v45 = vadd.f32 %v653_v42, %v3571_v25  ;;  %v737_v48 = vmul.f32 0.01, %v652_v38  ;;  %vm705_vm2 = vcmp.gt.f32.partialorder %v652_v38, 0.0  ;;  %v768_v60 = vsel %vm704_vm3, %v650_v41, %v736_v51 }
 0x1d5   :  { %v655_v47 = vpop.f32.mrf.mxu1  ;;  %1066 = vmatprep.mubr.bf16.mxu0 %v791_v43 }
 0x1d6   :  { %vm706_vm1 = vcmp.gt.f32.partialorder %v654_v45, 0.0  ;;  %v738_v49 = vmul.f32 0.01, %v654_v45  ;;  %v656_v50 = vadd.f32 %v655_v47, %v3568_v22  ;;  %1067 = vmatmul.mubr.bf16.gmra.mxu0 %v790_v46  ;;  %v769_v55 = vsel %vm705_vm2, %v652_v38, %v737_v48 }
 0x1d7   :  { %v659_v52 = vpop.f32.mrf.mxu1 }
 0x1d8   :  { %vm707_vm4 = vcmp.gt.f32.partialorder %v656_v50, 0.0  ;;  %v739_v27 = vmul.f32 0.01, %v656_v50  ;;  %v770_v26 = vsel %vm706_vm1, %v654_v45, %v738_v49  ;;  %v660_v57 = vadd.f32 %v659_v52, %v3571_v25 }
 0x1d9   :  { %v661_v53 = vpop.f32.mrf.mxu1  ;;  %v792_v62 = vpack.c.bf16 %v770_v26, %v768_v60  ;;  %v2999_v26 = vld [vmem:[#allocation2 + $0x94] ss:$8 sps:$4 sm:$0xff]  }
 0x1da   :  { %v662_v54 = vadd.f32 %v661_v53, %v3568_v22  ;;  %v771_v56 = vsel %vm707_vm4, %v656_v50, %v739_v27  ;;  %v740_v3 = vmul.f32 0.01, %v660_v57  ;;  %vm708_vm7 = vcmp.gt.f32.partialorder %v660_v57, 0.0  ;;  %v2996_v27 = vld [vmem:[#allocation2 + $0xa4] ss:$8 sps:$4 sm:$0xff]  }
 0x1db   :  { %v663_v58 = vpop.f32.mrf.mxu1  ;;  %v793_v59 = vpack.c.bf16 %v771_v56, %v769_v55  ;;  %v2994_v53 = vld [vmem:[#allocation2 + $0xa0] ss:$8 sps:$4 sm:$0xff]   ;;  %1459 = vmatprep.subr.bf16.mxu1 %v2996_v27  ;;  %v3003_v56 = vld [vmem:[#allocation4 + $0x70] ss:$8 sps:$4 sm:$0xff]   ;;  %v3011_v60 = vld [vmem:[#allocation4 + $0x54] ss:$8 sps:$4 sm:$0xff]  }
 0x1dc   :  { %v664_v61 = vadd.f32 %v663_v58, %v3571_v25  ;;  %v741_v0 = vmul.f32 0.01, %v662_v54  ;;  %vm709_vm6 = vcmp.gt.f32.partialorder %v662_v54, 0.0  ;;  %v772_v14 = vsel %vm708_vm7, %v660_v57, %v740_v3  ;;  %1460 = vmatpush2.bf16.msra.mxu1 %v2994_v53  ;;  %v3000_v55 = vld [vmem:[#allocation2 + $0x80] ss:$8 sps:$4 sm:$0xff]  }
 0x1dd   :  { %v665_v63 = vpop.f32.mrf.mxu1  ;;  %1076 = vmatprep.mubr.bf16.mxu0 %v793_v59  ;;  %1461 = vmatprep.subr.bf16.mxu1 %v2999_v26  ;;  %v3005_v57 = vld [vmem:[#allocation4 + $0x74] ss:$8 sps:$4 sm:$0xff]   ;;  %v3008_v58 = vld [vmem:[#allocation4 + $0x64] ss:$8 sps:$4 sm:$0xff]   ;;  %v3006_v59 = vld [vmem:[#allocation4 + $0x60] ss:$8 sps:$4 sm:$0xff]  }
 0x1de   :  { %vm710_vm5 = vcmp.gt.f32.partialorder %v664_v61, 0.0  ;;  %v742_v1 = vmul.f32 0.01, %v664_v61  ;;  %v666_v2 = vadd.f32 %v665_v63, %v3568_v22  ;;  %1077 = vmatmul.mubr.bf16.gmra.mxu0 %v792_v62  ;;  %v773_v9 = vsel %vm709_vm6, %v662_v54, %v741_v0  ;;  %v3002_v54 = vld [vmem:[#allocation2 + $0x84] ss:$8 sps:$4 sm:$0xff]   ;;  %1862 = vmatprep.subr.bf16.mxu0 %v3005_v57 }
 0x1df   :  { %v669_v4 = vpop.f32.mrf.mxu1  ;;  %1863 = vmatpush1.bf16.msra.mxu0 %v3003_v56  ;;  %v3014_v62 = vld [vmem:[#allocation4 + $0x44] ss:$8 sps:$4 sm:$0xff]   ;;  %v3012_v63 = vld [vmem:[#allocation4 + $0x40] ss:$8 sps:$4 sm:$0xff]   ;;  %v3017_v0 = vld [vmem:[#allocation4 + $0x34] ss:$8 sps:$4 sm:$0xff]  }
 0x1e0   :  { %vm711_vm8 = vcmp.gt.f32.partialorder %v666_v2, 0.0  ;;  %v743_v5 = vmul.f32 0.01, %v666_v2  ;;  %v774_v7 = vsel %vm710_vm5, %v664_v61, %v742_v1  ;;  %v670_v11 = vadd.f32 %v669_v4, %v3571_v25  ;;  %1864 = vmatprep.subr.bf16.mxu0 %v3008_v58  ;;  %v3009_v61 = vld [vmem:[#allocation4 + $0x50] ss:$8 sps:$4 sm:$0xff]  }
 0x1e1   :  { %v671_v6 = vpop.f32.mrf.mxu1  ;;  %v794_v16 = vpack.c.bf16 %v774_v7, %v772_v14  ;;  %v3015_v1 = vld [vmem:[#allocation4 + $0x30] ss:$8 sps:$4 sm:$0xff]   ;;  %v3018_v3 = vld [vmem:[#allocation4 + $0x20] ss:$8 sps:$4 sm:$0xff]   ;;  %v3023_v4 = vld [vmem:[#allocation4 + $0x14] ss:$8 sps:$4 sm:$0xff]  }
 0x1e2   :  { %v672_v8 = vadd.f32 %v671_v6, %v3568_v22  ;;  %v775_v10 = vsel %vm711_vm8, %v666_v2, %v743_v5  ;;  %v744_v28 = vmul.f32 0.01, %v670_v11  ;;  %vm712_vm11 = vcmp.gt.f32.partialorder %v670_v11, 0.0  ;;  %v3020_v2 = vld [vmem:[#allocation4 + $0x24] ss:$8 sps:$4 sm:$0xff]  }
 0x1e3   :  { %v673_v12 = vpop.f32.mrf.mxu1  ;;  %v795_v13 = vpack.c.bf16 %v775_v10, %v773_v9  ;;  %1865 = vmatpush1.bf16.msra.mxu0 %v3006_v59  ;;  %v3021_v5 = vld [vmem:[#allocation4 + $0x10] ss:$8 sps:$4 sm:$0xff]   ;;  %v3026_v6 = vld [vmem:[#allocation4 + $0x4] ss:$8 sps:$4 sm:$0xff]   ;;  %v3024_v7 = vld [vmem:[#allocation4] ss:$8 sps:$4 sm:$0xff]  }
 0x1e4   :  { %v674_v15 = vadd.f32 %v673_v12, %v3571_v25  ;;  %v745_v18 = vmul.f32 0.01, %v672_v8  ;;  %vm713_vm10 = vcmp.gt.f32.partialorder %v672_v8, 0.0  ;;  %v776_v39 = vsel %vm712_vm11, %v670_v11, %v744_v28  ;;  %1866 = vmatprep.subr.bf16.mxu0 %v3011_v60  ;;  %v3027_v9 = vld [vmem:[#allocation4 + $0xf0] ss:$8 sps:$4 sm:$0xff]  }
 0x1e5   :  { %v675_v17 = vpop.f32.mrf.mxu1  ;;  %1086 = vmatprep.mubr.bf16.mxu0 %v795_v13  ;;  %v3032_v10 = vld [vmem:[#allocation4 + $0xe4] ss:$8 sps:$4 sm:$0xff]   ;;  %v3030_v11 = vld [vmem:[#allocation4 + $0xe0] ss:$8 sps:$4 sm:$0xff]   ;;  %v3035_v12 = vld [vmem:[#allocation4 + $0xd4] ss:$8 sps:$4 sm:$0xff]  }
 0x1e6   :  { %vm714_vm9 = vcmp.gt.f32.partialorder %v674_v15, 0.0  ;;  %v746_v19 = vmul.f32 0.01, %v674_v15  ;;  %v676_v21 = vadd.f32 %v675_v17, %v3568_v22  ;;  %1087 = vmatmul.mubr.bf16.gmra.mxu0 %v794_v16  ;;  %v777_v34 = vsel %vm713_vm10, %v672_v8, %v745_v18  ;;  %v3029_v8 = vld [vmem:[#allocation4 + $0xf4] ss:$8 sps:$4 sm:$0xff]  }
 0x1e7   :  { %v679_v29 = vpop.f32.mrf.mxu1  ;;  %1867 = vmatpush1.bf16.msra.mxu0 %v3009_v61  ;;  %v3033_v13 = vld [vmem:[#allocation4 + $0xd0] ss:$8 sps:$4 sm:$0xff]   ;;  %v3038_v14 = vld [vmem:[#allocation4 + $0xc4] ss:$8 sps:$4 sm:$0xff]   ;;  %v3041_v16 = vld [vmem:[#allocation4 + $0xb4] ss:$8 sps:$4 sm:$0xff]  }
 0x1e8   :  { %vm715_vm12 = vcmp.gt.f32.partialorder %v676_v21, 0.0  ;;  %v747_v30 = vmul.f32 0.01, %v676_v21  ;;  %v778_v32 = vsel %vm714_vm9, %v674_v15, %v746_v19  ;;  %v680_v36 = vadd.f32 %v679_v29, %v3571_v25  ;;  %1868 = vmatprep.subr.bf16.mxu0 %v3014_v62  ;;  %v3036_v15 = vld [vmem:[#allocation4 + $0xc0] ss:$8 sps:$4 sm:$0xff]  }
 0x1e9   :  { %v681_v31 = vpop.f32.mrf.mxu1  ;;  %v796_v41 = vpack.c.bf16 %v778_v32, %v776_v39  ;;  %v3039_v17 = vld [vmem:[#allocation4 + $0xb0] ss:$8 sps:$4 sm:$0xff]   ;;  %v832_v18 = vld [vmem:[%s4075_s6] sm:$0x3] }
 0x1ea   :  { %v682_v33 = vadd.f32 %v681_v31, %v3568_v22  ;;  %v779_v35 = vsel %vm715_vm12, %v676_v21, %v747_v30  ;;  %v748_v46 = vmul.f32 0.01, %v680_v36  ;;  %vm716_vm15 = vcmp.gt.f32.partialorder %v680_v36, 0.0 }
 0x1eb   :  { %v683_v37 = vpop.f32.mrf.mxu1  ;;  %v797_v38 = vpack.c.bf16 %v779_v35, %v777_v34  ;;  %1869 = vmatpush1.bf16.msra.mxu0 %v3012_v63  ;;  %v3609_v19 = vrot.slane %v832_v18, %v3501_v23  ;;  %v3612_v21 = vrot.slane %v832_v18, %v3503_v24 }
 0x1ec   :  { %v684_v40 = vadd.f32 %v683_v37, %v3571_v25  ;;  %v749_v43 = vmul.f32 0.01, %v682_v33  ;;  %vm717_vm14 = vcmp.gt.f32.partialorder %v682_v33, 0.0  ;;  %v780_v52 = vsel %vm716_vm15, %v680_v36, %v748_v46  ;;  %1870 = vmatprep.subr.bf16.mxu0 %v3017_v0 }
 0x1ed   :  { %v685_v42 = vpop.f32.mrf.mxu1  ;;  %1096 = vmatprep.mubr.bf16.mxu0 %v797_v38 }
 0x1ee   :  { %vm718_vm13 = vcmp.gt.f32.partialorder %v684_v40, 0.0  ;;  %v750_v44 = vmul.f32 0.01, %v684_v40  ;;  %v686_v45 = vadd.f32 %v685_v42, %v3568_v22  ;;  %1097 = vmatmul.mubr.bf16.gmra.mxu0 %v796_v41  ;;  %v781_v49 = vsel %vm717_vm14, %v682_v33, %v749_v43  ;;  %v2997_v22 = vld [vmem:[#allocation2 + $0x90] ss:$8 sps:$4 sm:$0xff]  }
 0x1ef   :  { %1462 = vmatpush2.bf16.msra.mxu1 %v2997_v22  ;;  %1871 = vmatpush1.bf16.msra.mxu0 %v3015_v1 }
 0x1f0   :  { %vm719_vm0 = vcmp.gt.f32.partialorder %v686_v45, 0.0  ;;  %v751_v47 = vmul.f32 0.01, %v686_v45  ;;  %v782_v48 = vsel %vm718_vm13, %v684_v40, %v750_v44  ;;  %1463 = vmatprep.subr.bf16.mxu1 %v3002_v54  ;;  %1872 = vmatprep.subr.bf16.mxu0 %v3020_v2 }
 0x1f1   :  { %v798_v25 = vpack.c.bf16 %v782_v48, %v780_v52 }
 0x1f2   :  { %v783_v50 = vsel %vm719_vm0, %v686_v45, %v751_v47 }
 0x1f3   :  { %v799_v51 = vpack.c.bf16 %v783_v50, %v781_v49  ;;  %1464 = vmatpush2.bf16.msra.mxu1 %v3000_v55  ;;  %1873 = vmatpush1.bf16.msra.mxu0 %v3018_v3 }
 0x1f4   :  { %1874 = vmatprep.subr.bf16.mxu0 %v3023_v4 }
 0x1f5   :  { %1106 = vmatprep.mubr.bf16.mxu0 %v799_v51 }
 0x1f6   :  { %1107 = vmatmul.mubr.bf16.gmra.mxu0 %v798_v25 }
 0x1f7   :  { %1875 = vmatpush1.bf16.msra.mxu0 %v3021_v5 }
 0x1f8   :  { %1876 = vmatprep.subr.bf16.mxu0 %v3026_v6 }
 0x1fb   :  { %1877 = vmatpush1.bf16.msra.mxu0 %v3024_v7 }
 0x1fc   :  { %1878 = vmatprep.subr.bf16.mxu0 %v3029_v8 }
 0x1ff   :  { %1879 = vmatpush2.bf16.msra.mxu0 %v3027_v9 }
 0x200   :  { %1880 = vmatprep.subr.bf16.mxu0 %v3032_v10 }
 0x203   :  { %1881 = vmatpush2.bf16.msra.mxu0 %v3030_v11 }
 0x204   :  { %1882 = vmatprep.subr.bf16.mxu0 %v3035_v12 }
 0x207   :  { %1883 = vmatpush2.bf16.msra.mxu0 %v3033_v13 }
 0x208   :  { %1884 = vmatprep.subr.bf16.mxu0 %v3038_v14 }
 0x20b   :  { %1885 = vmatpush2.bf16.msra.mxu0 %v3036_v15 }
 0x20c   :  { %1886 = vmatprep.subr.bf16.mxu0 %v3041_v16 }
 0x20f   :  { %1887 = vmatpush2.bf16.msra.mxu0 %v3039_v17 }
 0x27e   :  { %v1038_v28 = vpop.f32.mrf.mxu0 }
 0x27f   :  { %v1039_v31 = vadd.f32 %v1038_v28, %v3612_v21 }
 0x280   :  { %v1040_v29 = vpop.f32.mrf.mxu0 }
 0x281   :  { %v1041_v30 = vadd.f32 %v1040_v29, %v3609_v19  ;;  %v1149_v38 = vmul.f32 0.01, %v1039_v31  ;;  %vm1117_vm3 = vcmp.gt.f32.partialorder %v1039_v31, 0.0 }
 0x282   :  { %v1042_v32 = vpop.f32.mrf.mxu0 }
 0x283   :  { %v1043_v33 = vadd.f32 %v1042_v32, %v3612_v21  ;;  %v1150_v35 = vmul.f32 0.01, %v1041_v30  ;;  %vm1118_vm2 = vcmp.gt.f32.partialorder %v1041_v30, 0.0  ;;  %v1181_v46 = vsel %vm1117_vm3, %v1039_v31, %v1149_v38 }
 0x284   :  { %v1044_v34 = vpop.f32.mrf.mxu0 }
 0x285   :  { %vm1119_vm1 = vcmp.gt.f32.partialorder %v1043_v33, 0.0  ;;  %v1151_v36 = vmul.f32 0.01, %v1043_v33  ;;  %v1045_v37 = vadd.f32 %v1044_v34, %v3609_v19  ;;  %v1182_v44 = vsel %vm1118_vm2, %v1041_v30, %v1150_v35 }
 0x286   :  { %v1048_v39 = vpop.f32.mrf.mxu0 }
 0x287   :  { %vm1120_vm4 = vcmp.gt.f32.partialorder %v1045_v37, 0.0  ;;  %v1152_v40 = vmul.f32 0.01, %v1045_v37  ;;  %v1183_v41 = vsel %vm1119_vm1, %v1043_v33, %v1151_v36  ;;  %v1049_v47 = vadd.f32 %v1048_v39, %v3612_v21 }
 0x288   :  { %v1050_v42 = vpop.f32.mrf.mxu0  ;;  %v1213_v50 = vpack.c.bf16 %v1183_v41, %v1181_v46 }
 0x289   :  { %v1051_v43 = vadd.f32 %v1050_v42, %v3609_v19  ;;  %v1184_v45 = vsel %vm1120_vm4, %v1045_v37, %v1152_v40  ;;  %v1153_v26 = vmul.f32 0.01, %v1049_v47  ;;  %vm1121_vm7 = vcmp.gt.f32.partialorder %v1049_v47, 0.0 }
 0x28a   :  { %v1052_v48 = vpop.f32.mrf.mxu0  ;;  %v1214_v49 = vpack.c.bf16 %v1184_v45, %v1182_v44 }
 0x28b   :  { %v1053_v51 = vadd.f32 %v1052_v48, %v3612_v21  ;;  %v1154_v25 = vmul.f32 0.01, %v1051_v43  ;;  %vm1122_vm6 = vcmp.gt.f32.partialorder %v1051_v43, 0.0  ;;  %v1185_v63 = vsel %vm1121_vm7, %v1049_v47, %v1153_v26 }
 0x28c   :  { %v1054_v52 = vpop.f32.mrf.mxu0  ;;  %1465 = vmatprep.mubr.bf16.mxu1 %v1214_v49 }
 0x28d   :  { %vm1123_vm5 = vcmp.gt.f32.partialorder %v1053_v51, 0.0  ;;  %v1155_v27 = vmul.f32 0.01, %v1053_v51  ;;  %v1055_v53 = vadd.f32 %v1054_v52, %v3609_v19  ;;  %1466 = vmatmul.mubr.bf16.vlgmr.msra.gmra.mxu1 %v1213_v50  ;;  %v1186_v58 = vsel %vm1122_vm6, %v1051_v43, %v1154_v25 }
 0x28e   :  { %v1058_v22 = vpop.f32.mrf.mxu0 }
 0x28f   :  { %vm1124_vm8 = vcmp.gt.f32.partialorder %v1055_v53, 0.0  ;;  %v1156_v54 = vmul.f32 0.01, %v1055_v53  ;;  %v1187_v56 = vsel %vm1123_vm5, %v1053_v51, %v1155_v27  ;;  %v1059_v60 = vadd.f32 %v1058_v22, %v3612_v21 }
 0x290   :  { %v1060_v55 = vpop.f32.mrf.mxu0  ;;  %v1215_v1 = vpack.c.bf16 %v1187_v56, %v1185_v63 }
 0x291   :  { %v1061_v57 = vadd.f32 %v1060_v55, %v3609_v19  ;;  %v1188_v59 = vsel %vm1124_vm8, %v1055_v53, %v1156_v54  ;;  %v1157_v6 = vmul.f32 0.01, %v1059_v60  ;;  %vm1125_vm11 = vcmp.gt.f32.partialorder %v1059_v60, 0.0 }
 0x292   :  { %v1062_v61 = vpop.f32.mrf.mxu0  ;;  %v1216_v62 = vpack.c.bf16 %v1188_v59, %v1186_v58 }
 0x293   :  { %v1063_v0 = vadd.f32 %v1062_v61, %v3612_v21  ;;  %v1158_v3 = vmul.f32 0.01, %v1061_v57  ;;  %vm1126_vm10 = vcmp.gt.f32.partialorder %v1061_v57, 0.0  ;;  %v1189_v17 = vsel %vm1125_vm11, %v1059_v60, %v1157_v6 }
 0x294   :  { %v1064_v2 = vpop.f32.mrf.mxu0  ;;  %1475 = vmatprep.mubr.bf16.mxu1 %v1216_v62 }
 0x295   :  { %vm1127_vm9 = vcmp.gt.f32.partialorder %v1063_v0, 0.0  ;;  %v1159_v4 = vmul.f32 0.01, %v1063_v0  ;;  %v1065_v5 = vadd.f32 %v1064_v2, %v3609_v19  ;;  %1476 = vmatmul.mubr.bf16.gmra.mxu1 %v1215_v1  ;;  %v1190_v12 = vsel %vm1126_vm10, %v1061_v57, %v1158_v3 }
 0x296   :  { %v1068_v7 = vpop.f32.mrf.mxu0 }
 0x297   :  { %vm1128_vm12 = vcmp.gt.f32.partialorder %v1065_v5, 0.0  ;;  %v1160_v8 = vmul.f32 0.01, %v1065_v5  ;;  %v1191_v10 = vsel %vm1127_vm9, %v1063_v0, %v1159_v4  ;;  %v1069_v14 = vadd.f32 %v1068_v7, %v3612_v21 }
 0x298   :  { %v1070_v9 = vpop.f32.mrf.mxu0  ;;  %v1217_v28 = vpack.c.bf16 %v1191_v10, %v1189_v17 }
 0x299   :  { %v1071_v11 = vadd.f32 %v1070_v9, %v3609_v19  ;;  %v1192_v13 = vsel %vm1128_vm12, %v1065_v5, %v1160_v8  ;;  %v1161_v33 = vmul.f32 0.01, %v1069_v14  ;;  %vm1129_vm15 = vcmp.gt.f32.partialorder %v1069_v14, 0.0 }
 0x29a   :  { %v1072_v15 = vpop.f32.mrf.mxu0  ;;  %v1218_v16 = vpack.c.bf16 %v1192_v13, %v1190_v12 }
 0x29b   :  { %v1073_v18 = vadd.f32 %v1072_v15, %v3612_v21  ;;  %v1162_v30 = vmul.f32 0.01, %v1071_v11  ;;  %vm1130_vm14 = vcmp.gt.f32.partialorder %v1071_v11, 0.0  ;;  %v1193_v44 = vsel %vm1129_vm15, %v1069_v14, %v1161_v33 }
 0x29c   :  { %v1074_v29 = vpop.f32.mrf.mxu0  ;;  %1485 = vmatprep.mubr.bf16.mxu1 %v1218_v16 }
 0x29d   :  { %vm1131_vm13 = vcmp.gt.f32.partialorder %v1073_v18, 0.0  ;;  %v1163_v31 = vmul.f32 0.01, %v1073_v18  ;;  %v1075_v32 = vadd.f32 %v1074_v29, %v3609_v19  ;;  %1486 = vmatmul.mubr.bf16.gmra.mxu1 %v1217_v28  ;;  %v1194_v39 = vsel %vm1130_vm14, %v1071_v11, %v1162_v30 }
 0x29e   :  { %v1078_v34 = vpop.f32.mrf.mxu0 }
 0x29f   :  { %vm1132_vm0 = vcmp.gt.f32.partialorder %v1075_v32, 0.0  ;;  %v1164_v35 = vmul.f32 0.01, %v1075_v32  ;;  %v1195_v37 = vsel %vm1131_vm13, %v1073_v18, %v1163_v31  ;;  %v1079_v41 = vadd.f32 %v1078_v34, %v3612_v21 }
 0x2a0   :  { %v1080_v36 = vpop.f32.mrf.mxu0  ;;  %v1219_v46 = vpack.c.bf16 %v1195_v37, %v1193_v44 }
 0x2a1   :  { %v1081_v38 = vadd.f32 %v1080_v36, %v3609_v19  ;;  %v1196_v40 = vsel %vm1132_vm0, %v1075_v32, %v1164_v35  ;;  %v1165_v51 = vmul.f32 0.01, %v1079_v41  ;;  %vm1133_vm3 = vcmp.gt.f32.partialorder %v1079_v41, 0.0 }
 0x2a2   :  { %v1082_v42 = vpop.f32.mrf.mxu0  ;;  %v1220_v43 = vpack.c.bf16 %v1196_v40, %v1194_v39 }
 0x2a3   :  { %v1083_v45 = vadd.f32 %v1082_v42, %v3612_v21  ;;  %v1166_v48 = vmul.f32 0.01, %v1081_v38  ;;  %vm1134_vm2 = vcmp.gt.f32.partialorder %v1081_v38, 0.0  ;;  %v1197_v58 = vsel %vm1133_vm3, %v1079_v41, %v1165_v51 }
 0x2a4   :  { %v1084_v47 = vpop.f32.mrf.mxu0  ;;  %1495 = vmatprep.mubr.bf16.mxu1 %v1220_v43 }
 0x2a5   :  { %vm1135_vm1 = vcmp.gt.f32.partialorder %v1083_v45, 0.0  ;;  %v1167_v49 = vmul.f32 0.01, %v1083_v45  ;;  %v1085_v50 = vadd.f32 %v1084_v47, %v3609_v19  ;;  %1496 = vmatmul.mubr.bf16.gmra.mxu1 %v1219_v46  ;;  %v1198_v22 = vsel %vm1134_vm2, %v1081_v38, %v1166_v48 }
 0x2a6   :  { %v1088_v52 = vpop.f32.mrf.mxu0 }
 0x2a7   :  { %vm1136_vm4 = vcmp.gt.f32.partialorder %v1085_v50, 0.0  ;;  %v1168_v25 = vmul.f32 0.01, %v1085_v50  ;;  %v1199_v53 = vsel %vm1135_vm1, %v1083_v45, %v1167_v49  ;;  %v1089_v55 = vadd.f32 %v1088_v52, %v3612_v21 }
 0x2a8   :  { %v1090_v27 = vpop.f32.mrf.mxu0  ;;  %v1221_v60 = vpack.c.bf16 %v1199_v53, %v1197_v58  ;;  %v3047_v53 = vld [vmem:[#allocation4 + $0x94] ss:$8 sps:$4 sm:$0xff]   ;;  %v3663_v58 = vld [vmem:[%s4080_s11 + $0x68] sm:$0xff]  }
 0x2a9   :  { %v1091_v26 = vadd.f32 %v1090_v27, %v3609_v19  ;;  %v1200_v54 = vsel %vm1136_vm4, %v1085_v50, %v1168_v25  ;;  %v1169_v1 = vmul.f32 0.01, %v1089_v55  ;;  %vm1137_vm7 = vcmp.gt.f32.partialorder %v1089_v55, 0.0  ;;  %v3044_v25 = vld [vmem:[#allocation4 + $0xa4] ss:$8 sps:$4 sm:$0xff]  }
 0x2aa   :  { %v1092_v56 = vpop.f32.mrf.mxu0  ;;  %v1222_v57 = vpack.c.bf16 %v1200_v54, %v1198_v22  ;;  %v3042_v27 = vld [vmem:[#allocation4 + $0xa0] ss:$8 sps:$4 sm:$0xff]   ;;  %1888 = vmatprep.subr.bf16.mxu0 %v3044_v25  ;;  %v3051_v54 = vld [vmem:[%s4080_s11 + $0x78] sm:$0xff]  }
 0x2ab   :  { %v1093_v59 = vadd.f32 %v1092_v56, %v3612_v21  ;;  %v1170_v62 = vmul.f32 0.01, %v1091_v26  ;;  %vm1138_vm6 = vcmp.gt.f32.partialorder %v1091_v26, 0.0  ;;  %v1201_v12 = vsel %vm1137_vm7, %v1089_v55, %v1169_v1  ;;  %1889 = vmatpush2.bf16.msra.mxu0 %v3042_v27  ;;  %v3048_v22 = vld [vmem:[#allocation4 + $0x80] ss:$8 sps:$4 sm:$0xff]   ;;  %v3052_v55 = vld [vmem:[%s4080_s11 + $0x38] sm:$0xff]   ;;  %2835 = vmatprep.subr.bf16.mxu1 %v3051_v54 }
 0x2ac   :  { %v1094_v61 = vpop.f32.mrf.mxu0  ;;  %1505 = vmatprep.mubr.bf16.mxu1 %v1222_v57  ;;  %1890 = vmatprep.subr.bf16.mxu0 %v3047_v53  ;;  %v3053_v56 = vld [vmem:[%s4080_s11 + $0x70] sm:$0xff]  }
 0x2ad   :  { %vm1139_vm5 = vcmp.gt.f32.partialorder %v1093_v59, 0.0  ;;  %v1171_v63 = vmul.f32 0.01, %v1093_v59  ;;  %v1095_v0 = vadd.f32 %v1094_v61, %v3609_v19  ;;  %1506 = vmatmul.mubr.bf16.gmra.mxu1 %v1221_v60  ;;  %v1202_v7 = vsel %vm1138_vm6, %v1091_v26, %v1170_v62  ;;  %v3050_v26 = vld [vmem:[#allocation4 + $0x84] ss:$8 sps:$4 sm:$0xff]   ;;  %v3658_v57 = vld [vmem:[%s4080_s11 + $0x30] sm:$0xff]  }
 0x2ae   :  { %v1098_v2 = vpop.f32.mrf.mxu0  ;;  %2843 = vmatpush3.bf16.msra.mxu1 %v3052_v55  ;;  %v3675_v60 = vld [vmem:[%s4080_s11 + $0x60] sm:$0xff]   ;;  %v3687_v62 = vld [vmem:[%s4080_s11 + $0x58] sm:$0xff]  }
 0x2af   :  { %vm1140_vm8 = vcmp.gt.f32.partialorder %v1095_v0, 0.0  ;;  %v1172_v3 = vmul.f32 0.01, %v1095_v0  ;;  %v1203_v5 = vsel %vm1139_vm5, %v1093_v59, %v1171_v63  ;;  %v1099_v9 = vadd.f32 %v1098_v2, %v3612_v21  ;;  %2836 = vmatprep.subr.bf16.mxu1 %v3053_v56  ;;  %v3670_v59 = vld [vmem:[%s4080_s11 + $0x28] sm:$0xff]   ;;  %v3682_v61 = vld [vmem:[%s4080_s11 + $0x20] sm:$0xff]  }
 0x2b0   :  { %v1100_v4 = vpop.f32.mrf.mxu0  ;;  %v1223_v14 = vpack.c.bf16 %v1203_v5, %v1201_v12  ;;  %v1261_v63 = vld [vmem:[%s4077_s8] sm:$0x3] }
 0x2b1   :  { %v1101_v6 = vadd.f32 %v1100_v4, %v3609_v19  ;;  %v1204_v8 = vsel %vm1140_vm8, %v1095_v0, %v1172_v3  ;;  %v1173_v28 = vmul.f32 0.01, %v1099_v9  ;;  %vm1141_vm11 = vcmp.gt.f32.partialorder %v1099_v9, 0.0 }
 0x2b2   :  { %v1102_v10 = vpop.f32.mrf.mxu0  ;;  %v1224_v11 = vpack.c.bf16 %v1204_v8, %v1202_v7  ;;  %2844 = vmatpush3.bf16.msra.mxu1 %v3658_v57  ;;  %v3695_v0 = vrot.slane %v1261_v63, %v3501_v23  ;;  %v3698_v1 = vrot.slane %v1261_v63, %v3503_v24 }
 0x2b3   :  { %v1103_v13 = vadd.f32 %v1102_v10, %v3612_v21  ;;  %v1174_v16 = vmul.f32 0.01, %v1101_v6  ;;  %vm1142_vm10 = vcmp.gt.f32.partialorder %v1101_v6, 0.0  ;;  %v1205_v39 = vsel %vm1141_vm11, %v1099_v9, %v1173_v28  ;;  %2837 = vmatprep.subr.bf16.mxu1 %v3663_v58 }
 0x2b4   :  { %v1104_v15 = vpop.f32.mrf.mxu0  ;;  %1515 = vmatprep.mubr.bf16.mxu1 %v1224_v11 }
 0x2b5   :  { %vm1143_vm9 = vcmp.gt.f32.partialorder %v1103_v13, 0.0  ;;  %v1175_v17 = vmul.f32 0.01, %v1103_v13  ;;  %v1105_v18 = vadd.f32 %v1104_v15, %v3609_v19  ;;  %1516 = vmatmul.mubr.bf16.gmra.mxu1 %v1223_v14  ;;  %v1206_v34 = vsel %vm1142_vm10, %v1101_v6, %v1174_v16 }
 0x2b6   :  { %v1108_v29 = vpop.f32.mrf.mxu0  ;;  %2845 = vmatpush3.bf16.msra.mxu1 %v3670_v59 }
 0x2b7   :  { %vm1144_vm12 = vcmp.gt.f32.partialorder %v1105_v18, 0.0  ;;  %v1176_v30 = vmul.f32 0.01, %v1105_v18  ;;  %v1207_v32 = vsel %vm1143_vm9, %v1103_v13, %v1175_v17  ;;  %v1109_v36 = vadd.f32 %v1108_v29, %v3612_v21  ;;  %2838 = vmatprep.subr.bf16.mxu1 %v3675_v60 }
 0x2b8   :  { %v1110_v31 = vpop.f32.mrf.mxu0  ;;  %v1225_v41 = vpack.c.bf16 %v1207_v32, %v1205_v39 }
 0x2b9   :  { %v1111_v33 = vadd.f32 %v1110_v31, %v3609_v19  ;;  %v1208_v35 = vsel %vm1144_vm12, %v1105_v18, %v1176_v30  ;;  %v1177_v46 = vmul.f32 0.01, %v1109_v36  ;;  %vm1145_vm15 = vcmp.gt.f32.partialorder %v1109_v36, 0.0 }
 0x2ba   :  { %v1112_v37 = vpop.f32.mrf.mxu0  ;;  %v1226_v38 = vpack.c.bf16 %v1208_v35, %v1206_v34  ;;  %2846 = vmatpush3.bf16.msra.mxu1 %v3682_v61 }
 0x2bb   :  { %v1113_v40 = vadd.f32 %v1112_v37, %v3612_v21  ;;  %v1178_v43 = vmul.f32 0.01, %v1111_v33  ;;  %vm1146_vm14 = vcmp.gt.f32.partialorder %v1111_v33, 0.0  ;;  %v1209_v52 = vsel %vm1145_vm15, %v1109_v36, %v1177_v46  ;;  %2839 = vmatprep.subr.bf16.mxu1 %v3687_v62 }
 0x2bc   :  { %v1114_v42 = vpop.f32.mrf.mxu0  ;;  %1525 = vmatprep.mubr.bf16.mxu1 %v1226_v38 }
 0x2bd   :  { %vm1147_vm13 = vcmp.gt.f32.partialorder %v1113_v40, 0.0  ;;  %v1179_v44 = vmul.f32 0.01, %v1113_v40  ;;  %v1115_v45 = vadd.f32 %v1114_v42, %v3609_v19  ;;  %1526 = vmatmul.mubr.bf16.gmra.mxu1 %v1225_v41  ;;  %v1210_v49 = vsel %vm1146_vm14, %v1111_v33, %v1178_v43  ;;  %v3045_v19 = vld [vmem:[#allocation4 + $0x90] ss:$8 sps:$4 sm:$0xff]  }
 0x2be   :  { %1891 = vmatpush2.bf16.msra.mxu0 %v3045_v19 }
 0x2bf   :  { %vm1148_vm0 = vcmp.gt.f32.partialorder %v1115_v45, 0.0  ;;  %v1180_v47 = vmul.f32 0.01, %v1115_v45  ;;  %v1211_v48 = vsel %vm1147_vm13, %v1113_v40, %v1179_v44  ;;  %1892 = vmatprep.subr.bf16.mxu0 %v3050_v26 }
 0x2c0   :  { %v1227_v21 = vpack.c.bf16 %v1211_v48, %v1209_v52 }
 0x2c1   :  { %v1212_v50 = vsel %vm1148_vm0, %v1115_v45, %v1180_v47 }
 0x2c2   :  { %v1228_v51 = vpack.c.bf16 %v1212_v50, %v1210_v49  ;;  %1893 = vmatpush2.bf16.msra.mxu0 %v3048_v22 }
 0x2c3   :  { %2771 = vmatprep.subr.bf16.mxu0 %v3051_v54 }
 0x2c4   :  { %1535 = vmatprep.mubr.bf16.mxu1 %v1228_v51 }
 0x2c5   :  { %1536 = vmatmul.mubr.bf16.gmra.mxu1 %v1227_v21 }
 0x34d   :  { %v1467_v2 = vpop.f32.mrf.mxu1 }
 0x34e   :  { %v1468_v5 = vadd.f32 %v1467_v2, %v3698_v1 }
 0x34f   :  { %v1469_v3 = vpop.f32.mrf.mxu1 }
 0x350   :  { %v1470_v4 = vadd.f32 %v1469_v3, %v3695_v0  ;;  %v1578_v12 = vmul.f32 0.01, %v1468_v5  ;;  %vm1546_vm3 = vcmp.gt.f32.partialorder %v1468_v5, 0.0 }
 0x351   :  { %v1471_v6 = vpop.f32.mrf.mxu1 }
 0x352   :  { %v1472_v7 = vadd.f32 %v1471_v6, %v3698_v1  ;;  %v1579_v9 = vmul.f32 0.01, %v1470_v4  ;;  %vm1547_vm2 = vcmp.gt.f32.partialorder %v1470_v4, 0.0  ;;  %v1610_v29 = vsel %vm1546_vm3, %v1468_v5, %v1578_v12 }
 0x353   :  { %v1473_v8 = vpop.f32.mrf.mxu1 }
 0x354   :  { %vm1548_vm1 = vcmp.gt.f32.partialorder %v1472_v7, 0.0  ;;  %v1580_v10 = vmul.f32 0.01, %v1472_v7  ;;  %v1474_v11 = vadd.f32 %v1473_v8, %v3695_v0  ;;  %v1611_v18 = vsel %vm1547_vm2, %v1470_v4, %v1579_v9 }
 0x355   :  { %v1477_v13 = vpop.f32.mrf.mxu1 }
 0x356   :  { %vm1549_vm4 = vcmp.gt.f32.partialorder %v1474_v11, 0.0  ;;  %v1581_v14 = vmul.f32 0.01, %v1474_v11  ;;  %v1612_v15 = vsel %vm1548_vm1, %v1472_v7, %v1580_v10  ;;  %v1478_v30 = vadd.f32 %v1477_v13, %v3698_v1 }
 0x357   :  { %v1479_v16 = vpop.f32.mrf.mxu1  ;;  %v1642_v33 = vpack.c.bf16 %v1612_v15, %v1610_v29 }
 0x358   :  { %v1480_v17 = vadd.f32 %v1479_v16, %v3695_v0  ;;  %v1613_v28 = vsel %vm1549_vm4, %v1474_v11, %v1581_v14  ;;  %v1582_v39 = vmul.f32 0.01, %v1478_v30  ;;  %vm1550_vm7 = vcmp.gt.f32.partialorder %v1478_v30, 0.0 }
 0x359   :  { %v1481_v31 = vpop.f32.mrf.mxu1  ;;  %v1643_v32 = vpack.c.bf16 %v1613_v28, %v1611_v18 }
 0x35a   :  { %v1482_v34 = vadd.f32 %v1481_v31, %v3698_v1  ;;  %v1583_v36 = vmul.f32 0.01, %v1480_v17  ;;  %vm1551_vm6 = vcmp.gt.f32.partialorder %v1480_v17, 0.0  ;;  %v1614_v50 = vsel %vm1550_vm7, %v1478_v30, %v1582_v39 }
 0x35b   :  { %v1483_v35 = vpop.f32.mrf.mxu1  ;;  %1894 = vmatprep.mubr.bf16.mxu0 %v1643_v32 }
 0x35c   :  { %vm1552_vm5 = vcmp.gt.f32.partialorder %v1482_v34, 0.0  ;;  %v1584_v37 = vmul.f32 0.01, %v1482_v34  ;;  %v1484_v38 = vadd.f32 %v1483_v35, %v3695_v0  ;;  %1895 = vmatmul.mubr.bf16.vlgmr.msra.gmra.mxu0 %v1642_v33  ;;  %v1615_v45 = vsel %vm1551_vm6, %v1480_v17, %v1583_v36 }
 0x35d   :  { %v1487_v40 = vpop.f32.mrf.mxu1  ;;  %2772 = vmatpush3.bf16.msra.mxu0 %v3052_v55 }
 0x35e   :  { %vm1553_vm8 = vcmp.gt.f32.partialorder %v1484_v38, 0.0  ;;  %v1585_v41 = vmul.f32 0.01, %v1484_v38  ;;  %2773 = vmatprep.subr.bf16.mxu0 %v3053_v56  ;;  %v1616_v43 = vsel %vm1552_vm5, %v1482_v34, %v1584_v37  ;;  %v1488_v47 = vadd.f32 %v1487_v40, %v3698_v1 }
 0x35f   :  { %v1489_v42 = vpop.f32.mrf.mxu1  ;;  %v1644_v52 = vpack.c.bf16 %v1616_v43, %v1614_v50 }
 0x360   :  { %v1490_v44 = vadd.f32 %v1489_v42, %v3695_v0  ;;  %v1617_v46 = vsel %vm1553_vm8, %v1484_v38, %v1585_v41  ;;  %v1586_v19 = vmul.f32 0.01, %v1488_v47  ;;  %vm1554_vm11 = vcmp.gt.f32.partialorder %v1488_v47, 0.0 }
 0x361   :  { %v1491_v48 = vpop.f32.mrf.mxu1  ;;  %v1645_v49 = vpack.c.bf16 %v1617_v46, %v1615_v45  ;;  %2774 = vmatpush3.bf16.msra.mxu0 %v3658_v57 }
 0x362   :  { %v1492_v51 = vadd.f32 %v1491_v48, %v3698_v1  ;;  %2775 = vmatprep.subr.bf16.mxu0 %v3663_v58  ;;  %v1587_v25 = vmul.f32 0.01, %v1490_v44  ;;  %vm1555_vm10 = vcmp.gt.f32.partialorder %v1490_v44, 0.0  ;;  %v1618_v4 = vsel %vm1554_vm11, %v1488_v47, %v1586_v19 }
 0x363   :  { %v1493_v21 = vpop.f32.mrf.mxu1  ;;  %1904 = vmatprep.mubr.bf16.mxu0 %v1645_v49 }
 0x364   :  { %vm1556_vm9 = vcmp.gt.f32.partialorder %v1492_v51, 0.0  ;;  %v1588_v27 = vmul.f32 0.01, %v1492_v51  ;;  %v1494_v53 = vadd.f32 %v1493_v21, %v3695_v0  ;;  %1905 = vmatmul.mubr.bf16.gmra.mxu0 %v1644_v52  ;;  %v1619_v57 = vsel %vm1555_vm10, %v1490_v44, %v1587_v25 }
 0x365   :  { %v1497_v26 = vpop.f32.mrf.mxu1  ;;  %2776 = vmatpush3.bf16.msra.mxu0 %v3670_v59 }
 0x366   :  { %vm1557_vm12 = vcmp.gt.f32.partialorder %v1494_v53, 0.0  ;;  %v1589_v22 = vmul.f32 0.01, %v1494_v53  ;;  %2777 = vmatprep.subr.bf16.mxu0 %v3675_v60  ;;  %v1620_v55 = vsel %vm1556_vm9, %v1492_v51, %v1588_v27  ;;  %v1498_v63 = vadd.f32 %v1497_v26, %v3698_v1 }
 0x367   :  { %v1499_v54 = vpop.f32.mrf.mxu1  ;;  %v1646_v5 = vpack.c.bf16 %v1620_v55, %v1618_v4 }
 0x368   :  { %v1500_v56 = vadd.f32 %v1499_v54, %v3695_v0  ;;  %v1621_v58 = vsel %vm1557_vm12, %v1494_v53, %v1589_v22  ;;  %v1590_v9 = vmul.f32 0.01, %v1498_v63  ;;  %vm1558_vm15 = vcmp.gt.f32.partialorder %v1498_v63, 0.0 }
 0x369   :  { %v1501_v2 = vpop.f32.mrf.mxu1  ;;  %v1647_v3 = vpack.c.bf16 %v1621_v58, %v1619_v57  ;;  %2778 = vmatpush3.bf16.msra.mxu0 %v3682_v61 }
 0x36a   :  { %v1502_v59 = vadd.f32 %v1501_v2, %v3698_v1  ;;  %2779 = vmatprep.subr.bf16.mxu0 %v3687_v62  ;;  %v1591_v60 = vmul.f32 0.01, %v1500_v56  ;;  %vm1559_vm14 = vcmp.gt.f32.partialorder %v1500_v56, 0.0  ;;  %v1622_v18 = vsel %vm1558_vm15, %v1498_v63, %v1590_v9 }
 0x36b   :  { %v1503_v6 = vpop.f32.mrf.mxu1  ;;  %1914 = vmatprep.mubr.bf16.mxu0 %v1647_v3 }
 0x36c   :  { %vm1560_vm13 = vcmp.gt.f32.partialorder %v1502_v59, 0.0  ;;  %v1592_v7 = vmul.f32 0.01, %v1502_v59  ;;  %v1504_v8 = vadd.f32 %v1503_v6, %v3695_v0  ;;  %1915 = vmatmul.mubr.bf16.gmra.mxu0 %v1646_v5  ;;  %v1623_v14 = vsel %vm1559_vm14, %v1500_v56, %v1591_v60 }
 0x36d   :  { %v1507_v10 = vpop.f32.mrf.mxu1 }
 0x36e   :  { %vm1561_vm0 = vcmp.gt.f32.partialorder %v1504_v8, 0.0  ;;  %v1593_v11 = vmul.f32 0.01, %v1504_v8  ;;  %v1624_v12 = vsel %vm1560_vm13, %v1502_v59, %v1592_v7  ;;  %v1508_v15 = vadd.f32 %v1507_v10, %v3698_v1 }
 0x36f   :  { %v1509_v61 = vpop.f32.mrf.mxu1  ;;  %v1648_v29 = vpack.c.bf16 %v1624_v12, %v1622_v18 }
 0x370   :  { %v1510_v13 = vadd.f32 %v1509_v61, %v3695_v0  ;;  %v1625_v62 = vsel %vm1561_vm0, %v1504_v8, %v1593_v11  ;;  %v1594_v34 = vmul.f32 0.01, %v1508_v15  ;;  %vm1562_vm3 = vcmp.gt.f32.partialorder %v1508_v15, 0.0 }
 0x371   :  { %v1511_v16 = vpop.f32.mrf.mxu1  ;;  %v1649_v17 = vpack.c.bf16 %v1625_v62, %v1623_v14 }
 0x372   :  { %v1512_v28 = vadd.f32 %v1511_v16, %v3698_v1  ;;  %v1595_v31 = vmul.f32 0.01, %v1510_v13  ;;  %vm1563_vm2 = vcmp.gt.f32.partialorder %v1510_v13, 0.0  ;;  %v1626_v45 = vsel %vm1562_vm3, %v1508_v15, %v1594_v34 }
 0x373   :  { %v1513_v30 = vpop.f32.mrf.mxu1  ;;  %1924 = vmatprep.mubr.bf16.mxu0 %v1649_v17 }
 0x374   :  { %vm1564_vm1 = vcmp.gt.f32.partialorder %v1512_v28, 0.0  ;;  %v1596_v32 = vmul.f32 0.01, %v1512_v28  ;;  %v1514_v33 = vadd.f32 %v1513_v30, %v3695_v0  ;;  %1925 = vmatmul.mubr.bf16.gmra.mxu0 %v1648_v29  ;;  %v1627_v40 = vsel %vm1563_vm2, %v1510_v13, %v1595_v31 }
 0x375   :  { %v1517_v35 = vpop.f32.mrf.mxu1 }
 0x376   :  { %vm1565_vm4 = vcmp.gt.f32.partialorder %v1514_v33, 0.0  ;;  %v1597_v36 = vmul.f32 0.01, %v1514_v33  ;;  %v1628_v38 = vsel %vm1564_vm1, %v1512_v28, %v1596_v32  ;;  %v1518_v42 = vadd.f32 %v1517_v35, %v3698_v1 }
 0x377   :  { %v1519_v37 = vpop.f32.mrf.mxu1  ;;  %v1650_v47 = vpack.c.bf16 %v1628_v38, %v1626_v45  ;;  %v3063_v38 = vld [vmem:[%s4080_s11 + $0x48] sm:$0xff]  }
 0x378   :  { %v1520_v39 = vadd.f32 %v1519_v37, %v3695_v0  ;;  %v1629_v41 = vsel %vm1565_vm4, %v1514_v33, %v1597_v36  ;;  %v1598_v52 = vmul.f32 0.01, %v1518_v42  ;;  %vm1566_vm7 = vcmp.gt.f32.partialorder %v1518_v42, 0.0  ;;  %v3060_v36 = vld [vmem:[%s4080_s11 + $0x18] sm:$0xff]   ;;  %v3062_v37 = vld [vmem:[%s4080_s11 + $0x10] sm:$0xff]  }
 0x379   :  { %v1521_v43 = vpop.f32.mrf.mxu1  ;;  %v1651_v44 = vpack.c.bf16 %v1629_v41, %v1627_v40  ;;  %2780 = vmatpush3.bf16.msra.mxu0 %v3060_v36  ;;  %2847 = vmatpush3.bf16.msra.mxu1 %v3060_v36  ;;  %v3065_v40 = vld [vmem:[%s4080_s11 + $0x40] sm:$0xff]  }
 0x37a   :  { %v1522_v46 = vadd.f32 %v1521_v43, %v3698_v1  ;;  %v1599_v49 = vmul.f32 0.01, %v1520_v39  ;;  %vm1567_vm6 = vcmp.gt.f32.partialorder %v1520_v39, 0.0  ;;  %v1630_v57 = vsel %vm1566_vm7, %v1518_v42, %v1598_v52  ;;  %v3066_v41 = vld [vmem:[%s4080_s11] sm:$0xff]  }
 0x37b   :  { %v1523_v48 = vpop.f32.mrf.mxu1  ;;  %1934 = vmatprep.mubr.bf16.mxu0 %v1651_v44  ;;  %v1690_v42 = vld [vmem:[%s4079_s10] sm:$0x3] }
 0x37c   :  { %vm1568_vm5 = vcmp.gt.f32.partialorder %v1522_v46, 0.0  ;;  %v1600_v50 = vmul.f32 0.01, %v1522_v46  ;;  %v1524_v51 = vadd.f32 %v1523_v48, %v3695_v0  ;;  %1935 = vmatmul.mubr.bf16.gmra.mxu0 %v1650_v47  ;;  %v1631_v26 = vsel %vm1567_vm6, %v1520_v39, %v1599_v49  ;;  %v3064_v39 = vld [vmem:[%s4080_s11 + $0x8] sm:$0xff]  }
 0x37d   :  { %v1527_v21 = vpop.f32.mrf.mxu1  ;;  %v3763_v43 = vrot.slane %v1690_v42, %v3501_v23  ;;  %v3766_v44 = vrot.slane %v1690_v42, %v3503_v24 }
 0x37e   :  { %vm1569_vm8 = vcmp.gt.f32.partialorder %v1524_v51, 0.0  ;;  %v1601_v25 = vmul.f32 0.01, %v1524_v51  ;;  %v1632_v53 = vsel %vm1568_vm5, %v1522_v46, %v1600_v50  ;;  %v1528_v54 = vadd.f32 %v1527_v21, %v3698_v1 }
 0x37f   :  { %v1529_v27 = vpop.f32.mrf.mxu1  ;;  %v1652_v63 = vpack.c.bf16 %v1632_v53, %v1630_v57 }
 0x380   :  { %v1530_v19 = vadd.f32 %v1529_v27, %v3695_v0  ;;  %v1633_v22 = vsel %vm1569_vm8, %v1524_v51, %v1601_v25  ;;  %v1602_v5 = vmul.f32 0.01, %v1528_v54  ;;  %vm1570_vm11 = vcmp.gt.f32.partialorder %v1528_v54, 0.0 }
 0x381   :  { %v1531_v55 = vpop.f32.mrf.mxu1  ;;  %v1653_v56 = vpack.c.bf16 %v1633_v22, %v1631_v26 }
 0x382   :  { %v1532_v58 = vadd.f32 %v1531_v55, %v3698_v1  ;;  %v1603_v3 = vmul.f32 0.01, %v1530_v19  ;;  %vm1571_vm10 = vcmp.gt.f32.partialorder %v1530_v19, 0.0  ;;  %v1634_v14 = vsel %vm1570_vm11, %v1528_v54, %v1602_v5 }
 0x383   :  { %v1533_v2 = vpop.f32.mrf.mxu1  ;;  %1944 = vmatprep.mubr.bf16.mxu0 %v1653_v56 }
 0x384   :  { %vm1572_vm9 = vcmp.gt.f32.partialorder %v1532_v58, 0.0  ;;  %v1604_v4 = vmul.f32 0.01, %v1532_v58  ;;  %v1534_v59 = vadd.f32 %v1533_v2, %v3695_v0  ;;  %1945 = vmatmul.mubr.bf16.gmra.mxu0 %v1652_v63  ;;  %v1635_v10 = vsel %vm1571_vm10, %v1530_v19, %v1603_v3 }
 0x385   :  { %v1537_v6 = vpop.f32.mrf.mxu1 }
 0x386   :  { %vm1573_vm12 = vcmp.gt.f32.partialorder %v1534_v59, 0.0  ;;  %v1605_v60 = vmul.f32 0.01, %v1534_v59  ;;  %v1636_v8 = vsel %vm1572_vm9, %v1532_v58, %v1604_v4  ;;  %v1538_v61 = vadd.f32 %v1537_v6, %v3698_v1 }
 0x387   :  { %v1539_v7 = vpop.f32.mrf.mxu1  ;;  %v1654_v15 = vpack.c.bf16 %v1636_v8, %v1634_v14 }
 0x388   :  { %v1540_v9 = vadd.f32 %v1539_v7, %v3695_v0  ;;  %v1637_v11 = vsel %vm1573_vm12, %v1534_v59, %v1605_v60  ;;  %v1606_v29 = vmul.f32 0.01, %v1538_v61  ;;  %vm1574_vm15 = vcmp.gt.f32.partialorder %v1538_v61, 0.0 }
 0x389   :  { %v1541_v12 = vpop.f32.mrf.mxu1  ;;  %v1655_v13 = vpack.c.bf16 %v1637_v11, %v1635_v10 }
 0x38a   :  { %v1542_v62 = vadd.f32 %v1541_v12, %v3698_v1  ;;  %v1607_v17 = vmul.f32 0.01, %v1540_v9  ;;  %vm1575_vm14 = vcmp.gt.f32.partialorder %v1540_v9, 0.0  ;;  %v1638_v35 = vsel %vm1574_vm15, %v1538_v61, %v1606_v29 }
 0x38b   :  { %v1543_v16 = vpop.f32.mrf.mxu1  ;;  %1954 = vmatprep.mubr.bf16.mxu0 %v1655_v13 }
 0x38c   :  { %vm1576_vm13 = vcmp.gt.f32.partialorder %v1542_v62, 0.0  ;;  %v1608_v18 = vmul.f32 0.01, %v1542_v62  ;;  %v1544_v28 = vadd.f32 %v1543_v16, %v3695_v0  ;;  %1955 = vmatmul.mubr.bf16.gmra.mxu0 %v1654_v15  ;;  %v1639_v32 = vsel %vm1575_vm14, %v1540_v9, %v1607_v17  ;;  %v3061_v0 = vld [vmem:[%s4080_s11 + $0x50] sm:$0xff]  }
 0x38d   :  { %2781 = vmatprep.subr.bf16.mxu0 %v3061_v0  ;;  %2840 = vmatprep.subr.bf16.mxu1 %v3061_v0 }
 0x38e   :  { %vm1577_vm0 = vcmp.gt.f32.partialorder %v1544_v28, 0.0  ;;  %v1609_v30 = vmul.f32 0.01, %v1544_v28  ;;  %v1640_v31 = vsel %vm1576_vm13, %v1542_v62, %v1608_v18  ;;  %2782 = vmatpush3.bf16.msra.mxu0 %v3062_v37  ;;  %2848 = vmatpush3.bf16.msra.mxu1 %v3062_v37 }
 0x38f   :  { %v1656_v1 = vpack.c.bf16 %v1640_v31, %v1638_v35  ;;  %2783 = vmatprep.subr.bf16.mxu0 %v3063_v38  ;;  %2841 = vmatprep.subr.bf16.mxu1 %v3063_v38 }
 0x390   :  { %v1641_v33 = vsel %vm1577_vm0, %v1544_v28, %v1609_v30 }
 0x391   :  { %v1657_v34 = vpack.c.bf16 %v1641_v33, %v1639_v32 }
 0x392   :  { %2784 = vmatpush3.bf16.msra.mxu0 %v3064_v39  ;;  %2849 = vmatpush3.bf16.msra.mxu1 %v3064_v39 }
 0x393   :  { %1964 = vmatprep.mubr.bf16.mxu0 %v1657_v34  ;;  %2785 = vmatprep.subr.bf16.mxu0 %v3065_v40 }
 0x394   :  { %1965 = vmatmul.mubr.bf16.gmra.mxu0 %v1656_v1  ;;  %2842 = vmatprep.subr.bf16.mxu1 %v3065_v40 }
 0x396   :  { %2786 = vmatpush3.bf16.msra.mxu0 %v3066_v41  ;;  %2850 = vmatpush3.bf16.msra.mxu1 %v3066_v41 }
 0x41c   :  { %v1896_v45 = vpop.f32.mrf.mxu0 }
 0x41d   :  { %v1897_v48 = vadd.f32 %v1896_v45, %v3766_v44 }
 0x41e   :  { %v1898_v46 = vpop.f32.mrf.mxu0 }
 0x41f   :  { %v1899_v47 = vadd.f32 %v1898_v46, %v3763_v43  ;;  %v2007_v23 = vmul.f32 0.01, %v1897_v48  ;;  %vm1975_vm3 = vcmp.gt.f32.partialorder %v1897_v48, 0.0 }
 0x420   :  { %v1900_v49 = vpop.f32.mrf.mxu0 }
 0x421   :  { %v1901_v50 = vadd.f32 %v1900_v49, %v3766_v44  ;;  %v2008_v52 = vmul.f32 0.01, %v1899_v47  ;;  %vm1976_vm2 = vcmp.gt.f32.partialorder %v1899_v47, 0.0  ;;  %v2039_v55 = vsel %vm1975_vm3, %v1897_v48, %v2007_v23 }
 0x422   :  { %v1902_v51 = vpop.f32.mrf.mxu0 }
 0x423   :  { %vm1977_vm1 = vcmp.gt.f32.partialorder %v1901_v50, 0.0  ;;  %v2009_v21 = vmul.f32 0.01, %v1901_v50  ;;  %v1903_v25 = vadd.f32 %v1902_v51, %v3763_v43  ;;  %v2040_v22 = vsel %vm1976_vm2, %v1899_v47, %v2008_v52 }
 0x424   :  { %v1906_v27 = vpop.f32.mrf.mxu0 }
 0x425   :  { %vm1978_vm4 = vcmp.gt.f32.partialorder %v1903_v25, 0.0  ;;  %v2010_v24 = vmul.f32 0.01, %v1903_v25  ;;  %v2041_v53 = vsel %vm1977_vm1, %v1901_v50, %v2009_v21  ;;  %v1907_v56 = vadd.f32 %v1906_v27, %v3766_v44 }
 0x426   :  { %v1908_v19 = vpop.f32.mrf.mxu0  ;;  %v2071_v63 = vpack.c.bf16 %v2041_v53, %v2039_v55 }
 0x427   :  { %v1909_v26 = vadd.f32 %v1908_v19, %v3763_v43  ;;  %v2042_v54 = vsel %vm1978_vm4, %v1903_v25, %v2010_v24  ;;  %v2011_v6 = vmul.f32 0.01, %v1907_v56  ;;  %vm1979_vm7 = vcmp.gt.f32.partialorder %v1907_v56, 0.0 }
 0x428   :  { %v1910_v57 = vpop.f32.mrf.mxu0  ;;  %v2072_v58 = vpack.c.bf16 %v2042_v54, %v2040_v22 }
 0x429   :  { %v1911_v2 = vadd.f32 %v1910_v57, %v3766_v44  ;;  %v2012_v4 = vmul.f32 0.01, %v1909_v26  ;;  %vm1980_vm6 = vcmp.gt.f32.partialorder %v1909_v26, 0.0  ;;  %v2043_v62 = vsel %vm1979_vm7, %v1907_v56, %v2011_v6 }
 0x42a   :  { %v1912_v3 = vpop.f32.mrf.mxu0  ;;  %2254 = vmatprep.mubr.bf16.mxu0 %v2072_v58 }
 0x42b   :  { %vm1981_vm5 = vcmp.gt.f32.partialorder %v1911_v2, 0.0  ;;  %v2013_v59 = vmul.f32 0.01, %v1911_v2  ;;  %v1913_v5 = vadd.f32 %v1912_v3, %v3763_v43  ;;  %2255 = vmatmul.mubr.bf16.vlgmr.msra.gmra.mxu0 %v2071_v63  ;;  %v2044_v11 = vsel %vm1980_vm6, %v1909_v26, %v2012_v4 }
 0x42c   :  { %v1916_v60 = vpop.f32.mrf.mxu0 }
 0x42d   :  { %vm1982_vm8 = vcmp.gt.f32.partialorder %v1913_v5, 0.0  ;;  %v2014_v7 = vmul.f32 0.01, %v1913_v5  ;;  %v2045_v9 = vsel %vm1981_vm5, %v1911_v2, %v2013_v59  ;;  %v1917_v12 = vadd.f32 %v1916_v60, %v3766_v44 }
 0x42e   :  { %v1918_v8 = vpop.f32.mrf.mxu0  ;;  %v2073_v16 = vpack.c.bf16 %v2045_v9, %v2043_v62 }
 0x42f   :  { %v1919_v10 = vadd.f32 %v1918_v8, %v3763_v43  ;;  %v2046_v61 = vsel %vm1982_vm8, %v1913_v5, %v2014_v7  ;;  %v2015_v30 = vmul.f32 0.01, %v1917_v12  ;;  %vm1983_vm11 = vcmp.gt.f32.partialorder %v1917_v12, 0.0 }
 0x430   :  { %v1920_v13 = vpop.f32.mrf.mxu0  ;;  %v2074_v14 = vpack.c.bf16 %v2046_v61, %v2044_v11 }
 0x431   :  { %v1921_v15 = vadd.f32 %v1920_v13, %v3766_v44  ;;  %v2016_v18 = vmul.f32 0.01, %v1919_v10  ;;  %vm1984_vm10 = vcmp.gt.f32.partialorder %v1919_v10, 0.0  ;;  %v2047_v39 = vsel %vm1983_vm11, %v1917_v12, %v2015_v30 }
 0x432   :  { %v1922_v17 = vpop.f32.mrf.mxu0  ;;  %2262 = vmatprep.mubr.bf16.mxu0 %v2074_v14 }
 0x433   :  { %vm1985_vm9 = vcmp.gt.f32.partialorder %v1921_v15, 0.0  ;;  %v2017_v28 = vmul.f32 0.01, %v1921_v15  ;;  %v1923_v29 = vadd.f32 %v1922_v17, %v3763_v43  ;;  %2263 = vmatmul.mubr.bf16.gmra.mxu0 %v2073_v16  ;;  %v2048_v1 = vsel %vm1984_vm10, %v1919_v10, %v2016_v18 }
 0x434   :  { %v1926_v31 = vpop.f32.mrf.mxu0 }
 0x435   :  { %vm1986_vm12 = vcmp.gt.f32.partialorder %v1923_v29, 0.0  ;;  %v2018_v32 = vmul.f32 0.01, %v1923_v29  ;;  %v2049_v34 = vsel %vm1985_vm9, %v1921_v15, %v2017_v28  ;;  %v1927_v0 = vadd.f32 %v1926_v31, %v3766_v44 }
 0x436   :  { %v1928_v33 = vpop.f32.mrf.mxu0  ;;  %v2075_v41 = vpack.c.bf16 %v2049_v34, %v2047_v39 }
 0x437   :  { %v1929_v35 = vadd.f32 %v1928_v33, %v3763_v43  ;;  %v2050_v36 = vsel %vm1986_vm12, %v1923_v29, %v2018_v32  ;;  %v2019_v48 = vmul.f32 0.01, %v1927_v0  ;;  %vm1987_vm15 = vcmp.gt.f32.partialorder %v1927_v0, 0.0 }
 0x438   :  { %v1930_v37 = vpop.f32.mrf.mxu0  ;;  %v2076_v38 = vpack.c.bf16 %v2050_v36, %v2048_v1 }
 0x439   :  { %v1931_v40 = vadd.f32 %v1930_v37, %v3766_v44  ;;  %v2020_v45 = vmul.f32 0.01, %v1929_v35  ;;  %vm1988_vm14 = vcmp.gt.f32.partialorder %v1929_v35, 0.0  ;;  %v2051_v27 = vsel %vm1987_vm15, %v1927_v0, %v2019_v48 }
 0x43a   :  { %v1932_v42 = vpop.f32.mrf.mxu0  ;;  %2270 = vmatprep.mubr.bf16.mxu0 %v2076_v38 }
 0x43b   :  { %vm1989_vm13 = vcmp.gt.f32.partialorder %v1931_v40, 0.0  ;;  %v2021_v46 = vmul.f32 0.01, %v1931_v40  ;;  %v1933_v47 = vadd.f32 %v1932_v42, %v3763_v43  ;;  %2271 = vmatmul.mubr.bf16.gmra.mxu0 %v2075_v41  ;;  %v2052_v25 = vsel %vm1988_vm14, %v1929_v35, %v2020_v45 }
 0x43c   :  { %v1936_v49 = vpop.f32.mrf.mxu0 }
 0x43d   :  { %vm1990_vm0 = vcmp.gt.f32.partialorder %v1933_v47, 0.0  ;;  %v2022_v50 = vmul.f32 0.01, %v1933_v47  ;;  %v2053_v51 = vsel %vm1989_vm13, %v1931_v40, %v2021_v46  ;;  %v1937_v24 = vadd.f32 %v1936_v49, %v3766_v44 }
 0x43e   :  { %v1938_v52 = vpop.f32.mrf.mxu0  ;;  %v2077_v26 = vpack.c.bf16 %v2053_v51, %v2051_v27 }
 0x43f   :  { %v1939_v21 = vadd.f32 %v1938_v52, %v3763_v43  ;;  %v2054_v23 = vsel %vm1990_vm0, %v1933_v47, %v2022_v50  ;;  %v2023_v58 = vmul.f32 0.01, %v1937_v24  ;;  %vm1991_vm3 = vcmp.gt.f32.partialorder %v1937_v24, 0.0 }
 0x440   :  { %v1940_v53 = vpop.f32.mrf.mxu0  ;;  %v2078_v19 = vpack.c.bf16 %v2054_v23, %v2052_v25 }
 0x441   :  { %v1941_v22 = vadd.f32 %v1940_v53, %v3766_v44  ;;  %v2024_v55 = vmul.f32 0.01, %v1939_v21  ;;  %vm1992_vm2 = vcmp.gt.f32.partialorder %v1939_v21, 0.0  ;;  %v2055_v9 = vsel %vm1991_vm3, %v1937_v24, %v2023_v58 }
 0x442   :  { %v1942_v54 = vpop.f32.mrf.mxu0  ;;  %2278 = vmatprep.mubr.bf16.mxu1 %v2078_v19 }
 0x443   :  { %vm1993_vm1 = vcmp.gt.f32.partialorder %v1941_v22, 0.0  ;;  %v2025_v56 = vmul.f32 0.01, %v1941_v22  ;;  %v1943_v57 = vadd.f32 %v1942_v54, %v3763_v43  ;;  %2279 = vmatmul.mubr.bf16.vlgmr.msra.gmra.mxu1 %v2077_v26  ;;  %v2056_v5 = vsel %vm1992_vm2, %v1939_v21, %v2024_v55 }
 0x444   :  { %v1946_v63 = vpop.f32.mrf.mxu0 }
 0x445   :  { %vm1994_vm4 = vcmp.gt.f32.partialorder %v1943_v57, 0.0  ;;  %v2026_v2 = vmul.f32 0.01, %v1943_v57  ;;  %v2057_v4 = vsel %vm1993_vm1, %v1941_v22, %v2025_v56  ;;  %v1947_v60 = vadd.f32 %v1946_v63, %v3766_v44  ;;  %v3803_v63 = vld [vmem:[%s4081_s12] ss:$0 sm:$0xff] }
 0x446   :  { %v1948_v3 = vpop.f32.mrf.mxu0  ;;  %v2079_v11 = vpack.c.bf16 %v2057_v4, %v2055_v9 }
 0x447   :  { %v1949_v59 = vadd.f32 %v1948_v3, %v3763_v43  ;;  %v2058_v6 = vsel %vm1994_vm4, %v1943_v57, %v2026_v2  ;;  %v2027_v62 = vmul.f32 0.01, %v1947_v60  ;;  %vm1995_vm7 = vcmp.gt.f32.partialorder %v1947_v60, 0.0 }
 0x448   :  { %v1950_v7 = vpop.f32.mrf.mxu0  ;;  %v2080_v8 = vpack.c.bf16 %v2058_v6, %v2056_v5 }
 0x449   :  { %v1951_v10 = vadd.f32 %v1950_v7, %v3766_v44  ;;  %v2028_v12 = vmul.f32 0.01, %v1949_v59  ;;  %vm1996_vm6 = vcmp.gt.f32.partialorder %v1949_v59, 0.0  ;;  %v2059_v34 = vsel %vm1995_vm7, %v1947_v60, %v2027_v62 }
 0x44a   :  { %v1952_v61 = vpop.f32.mrf.mxu0  ;;  %2286 = vmatprep.mubr.bf16.mxu1 %v2080_v8 }
 0x44b   :  { %vm1997_vm5 = vcmp.gt.f32.partialorder %v1951_v10, 0.0  ;;  %v2029_v13 = vmul.f32 0.01, %v1951_v10  ;;  %v1953_v14 = vadd.f32 %v1952_v61, %v3763_v43  ;;  %2287 = vmatmul.mubr.bf16.gmra.mxu1 %v2079_v11  ;;  %v2060_v29 = vsel %vm1996_vm6, %v1949_v59, %v2028_v12 }
 0x44c   :  { %v1956_v15 = vpop.f32.mrf.mxu0 }
 0x44d   :  { %vm1998_vm8 = vcmp.gt.f32.partialorder %v1953_v14, 0.0  ;;  %v2030_v16 = vmul.f32 0.01, %v1953_v14  ;;  %v2061_v18 = vsel %vm1997_vm5, %v1951_v10, %v2029_v13  ;;  %v1957_v31 = vadd.f32 %v1956_v15, %v3766_v44 }
 0x44e   :  { %v1958_v17 = vpop.f32.mrf.mxu0  ;;  %v2081_v1 = vpack.c.bf16 %v2061_v18, %v2059_v34 }
 0x44f   :  { %v1959_v28 = vadd.f32 %v1958_v17, %v3763_v43  ;;  %v2062_v30 = vsel %vm1998_vm8, %v1953_v14, %v2030_v16  ;;  %v2031_v39 = vmul.f32 0.01, %v1957_v31  ;;  %vm1999_vm11 = vcmp.gt.f32.partialorder %v1957_v31, 0.0 }
 0x450   :  { %v1960_v32 = vpop.f32.mrf.mxu0  ;;  %v2082_v33 = vpack.c.bf16 %v2062_v30, %v2060_v29 }
 0x451   :  { %v1961_v35 = vadd.f32 %v1960_v32, %v3766_v44  ;;  %v2032_v0 = vmul.f32 0.01, %v1959_v28  ;;  %vm2000_vm10 = vcmp.gt.f32.partialorder %v1959_v28, 0.0  ;;  %v2063_v52 = vsel %vm1999_vm11, %v1957_v31, %v2031_v39 }
 0x452   :  { %v1962_v36 = vpop.f32.mrf.mxu0  ;;  %2294 = vmatprep.mubr.bf16.mxu1 %v2082_v33 }
 0x453   :  { %vm2001_vm9 = vcmp.gt.f32.partialorder %v1961_v35, 0.0  ;;  %v2033_v37 = vmul.f32 0.01, %v1961_v35  ;;  %v1963_v38 = vadd.f32 %v1962_v36, %v3763_v43  ;;  %2295 = vmatmul.mubr.bf16.gmra.mxu1 %v2081_v1  ;;  %v2064_v47 = vsel %vm2000_vm10, %v1959_v28, %v2032_v0 }
 0x454   :  { %v1966_v40 = vpop.f32.mrf.mxu0 }
 0x455   :  { %vm2002_vm12 = vcmp.gt.f32.partialorder %v1963_v38, 0.0  ;;  %v2034_v41 = vmul.f32 0.01, %v1963_v38  ;;  %v2065_v45 = vsel %vm2001_vm9, %v1961_v35, %v2033_v37  ;;  %v1967_v49 = vadd.f32 %v1966_v40, %v3766_v44 }
 0x456   :  { %v1968_v42 = vpop.f32.mrf.mxu0  ;;  %v2083_v25 = vpack.c.bf16 %v2065_v45, %v2063_v52 }
 0x457   :  { %v1969_v46 = vadd.f32 %v1968_v42, %v3763_v43  ;;  %v2066_v48 = vsel %vm2002_vm12, %v1963_v38, %v2034_v41  ;;  %v2035_v19 = vmul.f32 0.01, %v1967_v49  ;;  %vm2003_vm15 = vcmp.gt.f32.partialorder %v1967_v49, 0.0 }
 0x458   :  { %v1970_v50 = vpop.f32.mrf.mxu0  ;;  %v2084_v51 = vpack.c.bf16 %v2066_v48, %v2064_v47 }
 0x459   :  { %v1971_v21 = vadd.f32 %v1970_v50, %v3766_v44  ;;  %v2036_v27 = vmul.f32 0.01, %v1969_v46  ;;  %vm2004_vm14 = vcmp.gt.f32.partialorder %v1969_v46, 0.0  ;;  %v2067_v57 = vsel %vm2003_vm15, %v1967_v49, %v2035_v19 }
 0x45a   :  { %v1972_v23 = vpop.f32.mrf.mxu0  ;;  %2302 = vmatprep.mubr.bf16.mxu1 %v2084_v51 }
 0x45b   :  { %vm2005_vm13 = vcmp.gt.f32.partialorder %v1971_v21, 0.0  ;;  %v2037_v24 = vmul.f32 0.01, %v1971_v21  ;;  %v1973_v53 = vadd.f32 %v1972_v23, %v3763_v43  ;;  %2303 = vmatmul.mubr.bf16.gmra.mxu1 %v2083_v25  ;;  %v2068_v54 = vsel %vm2004_vm14, %v1969_v46, %v2036_v27 }
 0x45d   :  { %vm2006_vm0 = vcmp.gt.f32.partialorder %v1973_v53, 0.0  ;;  %v2038_v26 = vmul.f32 0.01, %v1973_v53  ;;  %v2069_v22 = vsel %vm2005_vm13, %v1971_v21, %v2037_v24 }
 0x45e   :  { %v2085_v44 = vpack.c.bf16 %v2069_v22, %v2067_v57 }
 0x45f   :  { %v2070_v55 = vsel %vm2006_vm0, %v1973_v53, %v2038_v26 }
 0x460   :  { %v2086_v56 = vpack.c.bf16 %v2070_v55, %v2068_v54 }
 0x462   :  { %2310 = vmatprep.mubr.bf16.mxu1 %v2086_v56 }
 0x463   :  { %2311 = vmatmul.mubr.bf16.gmra.mxu1 %v2085_v44  ;;  %v3843_v44 = vand.u32 127, %v101_v20 }
 0x465   :  { %vm2321_vm1 = vcmp.eq.s32.totalorder %v3843_v44, 6 }
 0x4eb   :  { %v2787_v58 = vpop.f32.mrf.mxu0 }
 0x4ed   :  { %v2788_v43 = vpop.f32.mrf.mxu0 }
 0x4ee   :  { %v2789_v2 = vadd.f32 %v2788_v43, %v2787_v58 }
 0x4ef   :  { %v2790_v3 = vpop.f32.mrf.mxu0 }
 0x4f0   :  { %v3806_v4 = vadd.f32 %v2789_v2, %v3803_v63 }
 0x4f1   :  { %v2791_v59 = vpop.f32.mrf.mxu0 }
 0x4f2   :  { %v2338_v5 = vand.u32 2147483647, %v3806_v4  ;;  %v2792_v6 = vadd.f32 %v2791_v59, %v2790_v3 }
 0x4f3   :  { %v2793_v60 = vpop.f32.mrf.mxu0 }
 0x4f4   :  { %v2354_v7 = vsub.f32 0.0, %v2338_v5  ;;  %v3810_v8 = vadd.f32 %v2792_v6, %v3803_v63 }
 0x4f5   :  { %v2794_v9 = vpop.f32.mrf.mxu0 }
 0x4f6   :  { %v2370_v10 = vmul.f32 1.442695, %v2354_v7  ;;  %v2339_v11 = vand.u32 2147483647, %v3810_v8  ;;  %v2795_v61 = vadd.f32 %v2794_v9, %v2793_v60 }
 0x4f7   :  { %v2796_v12 = vpop.f32.mrf.mxu0 }
 0x4f8   :  { %3067 = vpow2.f32 %v2370_v10  ;;  %v2355_v13 = vsub.f32 0.0, %v2339_v11  ;;  %v3814_v14 = vadd.f32 %v2795_v61, %v3803_v63 }
 0x4f9   :  { %v2797_v62 = vpop.f32.mrf.mxu0 }
 0x4fa   :  { %v2372_v15 = vmul.f32 1.442695, %v2355_v13  ;;  %v2340_v16 = vand.u32 2147483647, %v3814_v14  ;;  %v2798_v17 = vadd.f32 %v2797_v62, %v2796_v12  ;;  %v2322_v62 = vmax.f32 %v3806_v4, 0.0 }
 0x4fb   :  { %v2799_v18 = vpop.f32.mrf.mxu0 }
 0x4fc   :  { %3069 = vpow2.f32 %v2372_v15  ;;  %v2356_v28 = vsub.f32 0.0, %v2340_v16  ;;  %v3818_v29 = vadd.f32 %v2798_v17, %v3803_v63  ;;  %v2323_v16 = vmax.f32 %v3810_v8, 0.0 }
 0x4fd   :  { %v2800_v30 = vpop.f32.mrf.mxu0 }
 0x4fe   :  { %v2374_v31 = vmul.f32 1.442695, %v2356_v28  ;;  %v2341_v32 = vand.u32 2147483647, %v3818_v29  ;;  %v2801_v33 = vadd.f32 %v2800_v30, %v2799_v18 }
 0x4ff   :  { %v2802_v34 = vpop.f32.mrf.mxu0 }
 0x500   :  { %3071 = vpow2.f32 %v2374_v31  ;;  %v2357_v35 = vsub.f32 0.0, %v2341_v32  ;;  %v3822_v1 = vadd.f32 %v2801_v33, %v3803_v63 }
 0x501   :  { %v2803_v36 = vpop.f32.mrf.mxu0 }
 0x502   :  { %v2376_v0 = vmul.f32 1.442695, %v2357_v35  ;;  %v2342_v37 = vand.u32 2147483647, %v3822_v1  ;;  %v2804_v38 = vadd.f32 %v2803_v36, %v2802_v34 }
 0x503   :  { %v2805_v39 = vpop.f32.mrf.mxu1 }
 0x504   :  { %3073 = vpow2.f32 %v2376_v0  ;;  %v2358_v40 = vsub.f32 0.0, %v2342_v37  ;;  %v3826_v41 = vadd.f32 %v2804_v38, %v3803_v63  ;;  %v2324_v37 = vmax.f32 %v3814_v14, 0.0 }
 0x505   :  { %v3068_v42 = vpop.eup %3067  ;;  %v2806_v45 = vpop.f32.mrf.mxu1 }
 0x506   :  { %v2402_v46 = vadd.f32 1.0, %v3068_v42  ;;  %v2378_v47 = vmul.f32 1.442695, %v2358_v40  ;;  %v2343_v48 = vand.u32 2147483647, %v3826_v41  ;;  %v2807_v49 = vadd.f32 %v2806_v45, %v2805_v39 }
 0x507   :  { %v2808_v50 = vpop.f32.mrf.mxu1  ;;  %v2405_v56 = vmul.f32 -0.5, %v3068_v42  ;;  %v2408_v59 = vand.u32 2147483647, %v3068_v42 }
 0x508   :  { %3075 = vlog2.f32 %v2402_v46  ;;  %v2359_v52 = vsub.f32 0.0, %v2343_v48  ;;  %v3832_v21 = vadd.f32 %v2807_v49, %v3803_v63 }
 0x509   :  { %v3829_v51 = vpop.eup %3069  ;;  %3077 = vpow2.f32 %v2378_v47  ;;  %v2809_v25 = vpop.f32.mrf.mxu1  ;;  %v2406_v10 = vadd.f32 1.0, %v2405_v56  ;;  %vm3856_vm2 = vcmp.lt.f32.partialorder %v2408_v59, 0.0004427343 }
 0x50a   :  { %v2411_v23 = vadd.f32 1.0, %v3829_v51  ;;  %v2380_v27 = vmul.f32 1.442695, %v2359_v52  ;;  %v2344_v24 = vand.u32 2147483647, %v3832_v21  ;;  %v2810_v53 = vadd.f32 %v2809_v25, %v2808_v50 }
 0x50b   :  { %v2811_v19 = vpop.f32.mrf.mxu1  ;;  %v2414_v6 = vmul.f32 -0.5, %v3829_v51  ;;  %v2407_v34 = vmul.f32 %v3068_v42, %v2406_v10  ;;  %v2417_v0 = vand.u32 2147483647, %v3829_v51 }
 0x50c   :  { %3079 = vlog2.f32 %v2411_v23  ;;  %v2360_v22 = vsub.f32 0.0, %v2344_v24  ;;  %v3839_v54 = vadd.f32 %v2810_v53, %v3803_v63 }
 0x50d   :  { %v3836_v26 = vpop.eup %3071  ;;  %3081 = vpow2.f32 %v2380_v27  ;;  %v2812_v55 = vpop.f32.mrf.mxu1  ;;  %v2415_v18 = vadd.f32 1.0, %v2414_v6  ;;  %vm2418_vm3 = vcmp.lt.f32.partialorder %v2417_v0, 0.0004427343 }
 0x50e   :  { %v2420_v57 = vadd.f32 1.0, %v3836_v26  ;;  %v2382_v58 = vmul.f32 1.442695, %v2360_v22  ;;  %v2345_v43 = vand.u32 2147483647, %v3839_v54  ;;  %v2813_v2 = vadd.f32 %v2812_v55, %v2811_v19 }
 0x50f   :  { %v2814_v3 = vpop.f32.mrf.mxu1  ;;  %v2423_v35 = vmul.f32 -0.5, %v3836_v26  ;;  %v2416_v50 = vmul.f32 %v3829_v51, %v2415_v18  ;;  %v2426_v52 = vand.u32 2147483647, %v3836_v26  ;;  %v2325_v22 = vmax.f32 %v3818_v29, 0.0 }
 0x510   :  { %3083 = vlog2.f32 %v2420_v57  ;;  %v2361_v60 = vsub.f32 0.0, %v2345_v43  ;;  %v3850_v7 = vadd.f32 %v2813_v2, %v3803_v63 }
 0x511   :  { %v3846_v5 = vpop.eup %3073  ;;  %3085 = vpow2.f32 %v2382_v58  ;;  %v2815_v9 = vpop.f32.mrf.mxu1  ;;  %v2424_v24 = vadd.f32 1.0, %v2423_v35  ;;  %vm3887_vm4 = vcmp.lt.f32.partialorder %v2426_v52, 0.0004427343 }
 0x512   :  { %v2429_v20 = vadd.f32 1.0, %v3846_v5  ;;  %v2384_v11 = vmul.f32 1.442695, %v2361_v60  ;;  %v2346_v61 = vand.u32 2147483647, %v3850_v7  ;;  %v2816_v12 = vadd.f32 %v2815_v9, %v2814_v3 }
 0x513   :  { %v2817_v13 = vpop.f32.mrf.mxu1  ;;  %v2432_v46 = vmul.f32 -0.5, %v3846_v5 }
 0x514   :  { %3087 = vlog2.f32 %v2429_v20  ;;  %v2362_v28 = vsub.f32 0.0, %v2346_v61  ;;  %v3862_v30 = vadd.f32 %v2816_v12, %v3803_v63  ;;  %v2425_v20 = vmul.f32 %v3836_v26, %v2424_v24 }
 0x515   :  { %v3076_v17 = vpop.eup %3075  ;;  %3089 = vpow2.f32 %v2384_v11  ;;  %v2818_v31 = vpop.f32.mrf.mxu1  ;;  %v2433_v58 = vadd.f32 1.0, %v2432_v46 }
 0x516   :  { %v3864_v32 = vpop.eup %3077  ;;  %v2404_v33 = vmul.f32 0.6931472, %v3076_v17  ;;  %v2819_v36 = vadd.f32 %v2818_v31, %v2817_v13  ;;  %v2386_v39 = vmul.f32 1.442695, %v2362_v28  ;;  %v2347_v47 = vand.u32 2147483647, %v3862_v30 }
 0x517   :  { %v2438_v38 = vadd.f32 1.0, %v3864_v32  ;;  %v2820_v40 = vpop.f32.mrf.mxu1  ;;  %v2441_v12 = vmul.f32 -0.5, %v3864_v32 }
 0x518   :  { %v2410_v45 = vsel %vm3856_vm2, %v2407_v34, %v2404_v33  ;;  %v3875_v42 = vadd.f32 %v2819_v36, %v3803_v63  ;;  %v2363_v53 = vsub.f32 0.0, %v2347_v47  ;;  %v2444_v33 = vand.u32 2147483647, %v3864_v32 }
 0x519   :  { %v3080_v48 = vpop.eup %3079  ;;  %v2546_v49 = vadd.f32 %v2410_v45, %v2322_v62  ;;  %3091 = vlog2.f32 %v2438_v38  ;;  %v2821_v25 = vpop.f32.mrf.mxu1  ;;  %v2327_v45 = vmax.f32 %v3826_v41, 0.0 }
 0x51a   :  { %v3879_v23 = vpop.eup %3081  ;;  %v2413_v27 = vmul.f32 0.6931472, %v3080_v48  ;;  %3093 = vpow2.f32 %v2386_v39  ;;  %v2388_v51 = vmul.f32 1.442695, %v2363_v53  ;;  %v2348_v43 = vand.u32 2147483647, %v3875_v42 }
 0x51b   :  { %v2562_v19 = vadd.f32 0.0001, %v2546_v49  ;;  %v2447_v55 = vadd.f32 1.0, %v3879_v23  ;;  %v2823_v56 = vpop.f32.mrf.mxu1  ;;  %v2822_v18 = vadd.f32 %v2821_v25, %v2820_v40  ;;  %v2326_v40 = vmax.f32 %v3822_v1, 0.0 }
 0x51c   :  { %v2419_v57 = vsel %vm2418_vm3, %v2416_v50, %v2413_v27  ;;  %v2364_v11 = vsub.f32 0.0, %v2348_v43  ;;  %vm3923_vm6 = vcmp.lt.f32.partialorder %v2444_v33, 0.0004427343 }
 0x51d   :  { %v3084_v2 = vpop.eup %3083  ;;  %v2578_v3 = vsel %vm2321_vm1, %v2562_v19, %v3806_v4  ;;  %v2547_v59 = vadd.f32 %v2419_v57, %v2323_v16  ;;  %3095 = vlog2.f32 %v2447_v55  ;;  %v2824_v60 = vpop.f32.mrf.mxu1  ;;  %v2435_v4 = vand.u32 2147483647, %v3846_v5 }
 0x51e   :  { %v3891_v9 = vpop.eup %3085  ;;  %2594 = vst [vmem:[%s4082_s13] sm:$0xff] %v2578_v3  ;;  %v2422_v10 = vmul.f32 0.6931472, %v3084_v2  ;;  %3097 = vpow2.f32 %v2388_v51  ;;  %v2434_v16 = vmul.f32 %v3846_v5, %v2433_v58  ;;  %v2390_v17 = vmul.f32 1.442695, %v2364_v11 }
 0x51f   :  { %v2563_v61 = vadd.f32 0.0001, %v2547_v59  ;;  %v2456_v13 = vadd.f32 1.0, %v3891_v9  ;;  %v2826_v62 = vpop.f32.mrf.mxu1  ;;  %v2450_v5 = vmul.f32 -0.5, %v3879_v23  ;;  %v3914_v0 = vadd.f32 %v2822_v18, %v3803_v63 }
 0x520   :  { %v2428_v15 = vsel %vm3887_vm4, %v2425_v20, %v2422_v10  ;;  %vm2436_vm5 = vcmp.lt.f32.partialorder %v2435_v4, 0.0004427343  ;;  %v2459_v27 = vmul.f32 -0.5, %v3891_v9  ;;  %v2825_v53 = vadd.f32 %v2824_v60, %v2823_v56 }
 0x521   :  { %v3088_v28 = vpop.eup %3087  ;;  %v2579_v26 = vsel %vm2321_vm1, %v2563_v61, %v3810_v8  ;;  %v2548_v31 = vadd.f32 %v2428_v15, %v2324_v37  ;;  %3099 = vlog2.f32 %v2456_v13  ;;  %v2827_v34 = vpop.f32.mrf.mxu1  ;;  %v2442_v8 = vadd.f32 1.0, %v2441_v12 }
 0x522   :  { %v3907_v35 = vpop.eup %3089  ;;  %2595 = vst [vmem:[%s4082_s13 + $0x8] sm:$0xff] %v2579_v26  ;;  %v2431_v36 = vmul.f32 0.6931472, %v3088_v28  ;;  %3101 = vpow2.f32 %v2390_v17  ;;  %v2349_v46 = vand.u32 2147483647, %v3914_v0  ;;  %v2451_v25 = vadd.f32 1.0, %v2450_v5 }
 0x523   :  { %v2564_v38 = vadd.f32 0.0001, %v2548_v31  ;;  %v2465_v37 = vadd.f32 1.0, %v3907_v35  ;;  %v2829_v50 = vpop.f32.mrf.mxu1  ;;  %v2443_v55 = vmul.f32 %v3864_v32, %v2442_v8  ;;  %v2453_v57 = vand.u32 2147483647, %v3879_v23 }
 0x524   :  { %v2437_v39 = vsel %vm2436_vm5, %v2434_v16, %v2431_v36  ;;  %v2365_v24 = vsub.f32 0.0, %v2349_v46  ;;  %v2328_v58 = vmax.f32 %v3832_v21, 0.0  ;;  %v2462_v51 = vand.u32 2147483647, %v3891_v9 }
 0x525   :  { %v2580_v47 = vsel %vm2321_vm1, %v2564_v38, %v3814_v14  ;;  %v2549_v48 = vadd.f32 %v2437_v39, %v2325_v22  ;;  %3103 = vlog2.f32 %v2465_v37  ;;  %v3944_v59 = vadd.f32 %v2825_v53, %v3803_v63  ;;  %v2830_v6 = vpop.f32.mrf.mxu1 }
 0x526   :  { %v3092_v52 = vpop.eup %3091  ;;  %2596 = vst [vmem:[%s4082_s13 + $0x10] sm:$0xff] %v2580_v47  ;;  %v2392_v2 = vmul.f32 1.442695, %v2365_v24  ;;  %v2828_v32 = vadd.f32 %v2827_v34, %v2826_v62  ;;  %v2452_v20 = vmul.f32 %v3879_v23, %v2451_v25  ;;  %v2460_v11 = vadd.f32 1.0, %v2459_v27 }
 0x527   :  { %v3931_v19 = vpop.eup %3093  ;;  %v2565_v14 = vadd.f32 0.0001, %v2549_v48  ;;  %v2440_v22 = vmul.f32 0.6931472, %v3092_v52  ;;  %v2468_v4 = vmul.f32 -0.5, %v3907_v35  ;;  %v2831_v15 = vadd.f32 %v2830_v6, %v2829_v50  ;;  %v2832_v28 = vpop.f32.mrf.mxu1 }
 0x528   :  { %v2474_v43 = vadd.f32 1.0, %v3931_v19  ;;  %v2350_v12 = vand.u32 2147483647, %v3944_v59  ;;  %vm2454_vm7 = vcmp.lt.f32.partialorder %v2453_v57, 0.0004427343  ;;  %v3960_v18 = vadd.f32 %v2828_v32, %v3803_v63 }
 0x529   :  { %v2581_v3 = vsel %vm2321_vm1, %v2565_v14, %v3818_v29  ;;  %v2446_v56 = vsel %vm3923_vm6, %v2443_v55, %v2440_v22  ;;  %vm3955_vm8 = vcmp.lt.f32.partialorder %v2462_v51, 0.0004427343  ;;  %v2471_v34 = vand.u32 2147483647, %v3907_v35  ;;  %v2833_v49 = vpop.f32.mrf.mxu1 }
 0x52a   :  { %v3096_v60 = vpop.eup %3095  ;;  %2597 = vst [vmem:[%s4082_s13 + $0x18] sm:$0xff] %v2581_v3  ;;  %v2550_v10 = vadd.f32 %v2446_v56, %v2326_v40  ;;  %3105 = vlog2.f32 %v2474_v43  ;;  %v2366_v23 = vsub.f32 0.0, %v2350_v12  ;;  %v2461_v38 = vmul.f32 %v3891_v9, %v2460_v11 }
 0x52b   :  { %v3950_v61 = vpop.eup %3097  ;;  %v2449_v29 = vmul.f32 0.6931472, %v3096_v60  ;;  %3107 = vpow2.f32 %v2392_v2  ;;  %v2469_v8 = vadd.f32 1.0, %v2468_v4  ;;  %v2477_v40 = vmul.f32 -0.5, %v3931_v19 }
 0x52c   :  { %v2566_v13 = vadd.f32 0.0001, %v2550_v10  ;;  %v2483_v62 = vadd.f32 1.0, %v3950_v61  ;;  %v2394_v37 = vmul.f32 1.442695, %v2366_v23  ;;  %v2329_v47 = vmax.f32 %v3839_v54, 0.0 }
 0x52d   :  { %v2455_v16 = vsel %vm2454_vm7, %v2452_v20, %v2449_v29  ;;  %v2351_v48 = vand.u32 2147483647, %v3960_v18  ;;  %vm2472_vm9 = vcmp.lt.f32.partialorder %v2471_v34, 0.0004427343  ;;  %v2470_v27 = vmul.f32 %v3907_v35, %v2469_v8 }
 0x52e   :  { %v3100_v26 = vpop.eup %3099  ;;  %v2582_v31 = vsel %vm2321_vm1, %v2566_v13, %v3822_v1  ;;  %v2551_v33 = vadd.f32 %v2455_v16, %v2327_v45  ;;  %3109 = vlog2.f32 %v2483_v62  ;;  %v3975_v45 = vadd.f32 %v2831_v15, %v3803_v63 }
 0x52f   :  { %v3966_v36 = vpop.eup %3101  ;;  %2598 = vst [vmem:[%s4082_s13 + $0x20] sm:$0xff] %v2582_v31  ;;  %v2458_v5 = vmul.f32 0.6931472, %v3100_v26  ;;  %3111 = vpow2.f32 %v2394_v37  ;;  %v2486_v24 = vmul.f32 -0.5, %v3950_v61  ;;  %v2367_v53 = vsub.f32 0.0, %v2351_v48 }
 0x530   :  { %v2567_v39 = vadd.f32 0.0001, %v2551_v33  ;;  %v2492_v1 = vadd.f32 1.0, %v3966_v36  ;;  %v2478_v22 = vadd.f32 1.0, %v2477_v40  ;;  %v2352_v55 = vand.u32 2147483647, %v3975_v45 }
 0x531   :  { %v2464_v46 = vsel %vm3955_vm8, %v2461_v38, %v2458_v5  ;;  %v2834_v57 = vadd.f32 %v2833_v49, %v2832_v28  ;;  %v2487_v32 = vadd.f32 1.0, %v2486_v24  ;;  %v2495_v6 = vmul.f32 -0.5, %v3966_v36 }
 0x532   :  { %v3104_v9 = vpop.eup %3103  ;;  %v2583_v50 = vsel %vm2321_vm1, %v2567_v39, %v3826_v41  ;;  %v2552_v52 = vadd.f32 %v2464_v46, %v2328_v58  ;;  %3113 = vlog2.f32 %v2492_v1  ;;  %v2480_v41 = vand.u32 2147483647, %v3931_v19 }
 0x533   :  { %2599 = vst [vmem:[%s4082_s13 + $0x28] sm:$0xff] %v2583_v50  ;;  %v2467_v25 = vmul.f32 0.6931472, %v3104_v9  ;;  %v2396_v58 = vmul.f32 1.442695, %v2367_v53  ;;  %v2368_v3 = vsub.f32 0.0, %v2352_v55  ;;  %v3995_v35 = vadd.f32 %v2834_v57, %v3803_v63 }
 0x534   :  { %v2568_v14 = vadd.f32 0.0001, %v2552_v52  ;;  %v2479_v11 = vmul.f32 %v3931_v19, %v2478_v22  ;;  %v2330_v29 = vmax.f32 %v3850_v7, 0.0  ;;  %vm2481_vm10 = vcmp.lt.f32.partialorder %v2480_v41, 0.0004427343 }
 0x535   :  { %v2473_v51 = vsel %vm2472_vm9, %v2470_v27, %v2467_v25  ;;  %3115 = vpow2.f32 %v2396_v58  ;;  %v2489_v63 = vand.u32 2147483647, %v3950_v61  ;;  %v2353_v62 = vand.u32 2147483647, %v3995_v35 }
 0x536   :  { %v2584_v43 = vsel %vm2321_vm1, %v2568_v14, %v3832_v21  ;;  %v2553_v2 = vadd.f32 %v2473_v51, %v2329_v47  ;;  %v2398_v21 = vmul.f32 1.442695, %v2368_v3  ;;  %v2331_v16 = vmax.f32 %v3862_v30, 0.0 }
 0x537   :  { %v3106_v56 = vpop.eup %3105  ;;  %2600 = vst [vmem:[%s4082_s13 + $0x30] sm:$0xff] %v2584_v43  ;;  %v2488_v23 = vmul.f32 %v3950_v61, %v2487_v32  ;;  %v2496_v28 = vadd.f32 1.0, %v2495_v6  ;;  %v2369_v26 = vsub.f32 0.0, %v2353_v62  ;;  %vm2490_vm11 = vcmp.lt.f32.partialorder %v2489_v63, 0.0004427343 }
 0x538   :  { %v3108_v60 = vpop.eup %3107  ;;  %v2569_v10 = vadd.f32 0.0001, %v2553_v2  ;;  %v2476_v20 = vmul.f32 0.6931472, %v3106_v56  ;;  %3117 = vpow2.f32 %v2398_v21  ;;  %v2332_v61 = vmax.f32 %v3875_v42, 0.0 }
 0x539   :  { %v2501_v4 = vadd.f32 1.0, %v3108_v60  ;;  %v2400_v5 = vmul.f32 1.442695, %v2369_v26  ;;  %v2497_v1 = vmul.f32 %v3966_v36, %v2496_v28  ;;  %v2504_v47 = vmul.f32 -0.5, %v3108_v60 }
 0x53a   :  { %v2585_v12 = vsel %vm2321_vm1, %v2569_v10, %v3839_v54  ;;  %v2482_v13 = vsel %vm2481_vm10, %v2479_v11, %v2476_v20  ;;  %v2498_v54 = vand.u32 2147483647, %v3966_v36  ;;  %v2507_v36 = vand.u32 2147483647, %v3108_v60 }
 0x53b   :  { %v3110_v15 = vpop.eup %3109  ;;  %2601 = vst [vmem:[%s4082_s13 + $0x38] sm:$0xff] %v2585_v12  ;;  %v2554_v19 = vadd.f32 %v2482_v13, %v2330_v29  ;;  %3119 = vlog2.f32 %v2501_v4  ;;  %v2505_v52 = vadd.f32 1.0, %v2504_v47  ;;  %v2333_v57 = vmax.f32 %v3914_v0, 0.0 }
 0x53c   :  { %v2485_v17 = vmul.f32 0.6931472, %v3110_v15  ;;  %v3112_v33 = vpop.eup %3111  ;;  %3121 = vpow2.f32 %v2400_v5  ;;  %vm2499_vm12 = vcmp.lt.f32.partialorder %v2498_v54, 0.0004427343  ;;  %vm2508_vm13 = vcmp.lt.f32.partialorder %v2507_v36, 0.0004427343 }
 0x53d   :  { %v2570_v31 = vadd.f32 0.0001, %v2554_v19  ;;  %v2510_v39 = vadd.f32 1.0, %v3112_v33  ;;  %v2513_v53 = vmul.f32 -0.5, %v3112_v33  ;;  %v2506_v55 = vmul.f32 %v3108_v60, %v2505_v52 }
 0x53e   :  { %v2491_v34 = vsel %vm2490_vm11, %v2488_v23, %v2485_v17  ;;  %v2516_v43 = vand.u32 2147483647, %v3112_v33  ;;  %v2334_v6 = vmax.f32 %v3944_v59, 0.0  ;;  %v2335_v17 = vmax.f32 %v3960_v18, 0.0 }
 0x53f   :  { %v3114_v38 = vpop.eup %3113  ;;  %v2586_v8 = vsel %vm2321_vm1, %v2570_v31, %v3850_v7  ;;  %v2555_v37 = vadd.f32 %v2491_v34, %v2331_v16  ;;  %3123 = vlog2.f32 %v2510_v39  ;;  %v2514_v41 = vadd.f32 1.0, %v2513_v53 }
 0x540   :  { %2602 = vst [vmem:[%s4082_s13 + $0x40] sm:$0xff] %v2586_v8  ;;  %v2494_v40 = vmul.f32 0.6931472, %v3114_v38  ;;  %vm2517_vm14 = vcmp.lt.f32.partialorder %v2516_v43, 0.0004427343  ;;  %v2336_v34 = vmax.f32 %v3975_v45, 0.0 }
 0x541   :  { %v2571_v46 = vadd.f32 0.0001, %v2555_v37  ;;  %v2515_v20 = vmul.f32 %v3112_v33, %v2514_v41 }
 0x542   :  { %v2500_v48 = vsel %vm2499_vm12, %v2497_v1, %v2494_v40  ;;  %v3116_v9 = vpop.eup %3115 }
 0x543   :  { %v2587_v7 = vsel %vm2321_vm1, %v2571_v46, %v3862_v30  ;;  %v2556_v49 = vadd.f32 %v2500_v48, %v2332_v61  ;;  %v2519_v25 = vadd.f32 1.0, %v3116_v9  ;;  %v2525_v4 = vand.u32 2147483647, %v3116_v9 }
 0x544   :  { %2603 = vst [vmem:[%s4082_s13 + $0x48] sm:$0xff] %v2587_v7  ;;  %v2337_v48 = vmax.f32 %v3995_v35, 0.0 }
 0x545   :  { %v2572_v50 = vadd.f32 0.0001, %v2556_v49  ;;  %v3118_v27 = vpop.eup %3117  ;;  %3125 = vlog2.f32 %v2519_v25  ;;  %vm2526_vm15 = vcmp.lt.f32.partialorder %v2525_v4, 0.0004427343 }
 0x546   :  { %v2528_v30 = vadd.f32 1.0, %v3118_v27  ;;  %v2531_v11 = vmul.f32 -0.5, %v3118_v27  ;;  %v2534_v16 = vand.u32 2147483647, %v3118_v27 }
 0x547   :  { %v2588_v24 = vsel %vm2321_vm1, %v2572_v50, %v3875_v42  ;;  %v2522_v42 = vmul.f32 -0.5, %v3116_v9 }
 0x548   :  { %v3120_v14 = vpop.eup %3119  ;;  %2604 = vst [vmem:[%s4082_s13 + $0x50] sm:$0xff] %v2588_v24  ;;  %3127 = vlog2.f32 %v2528_v30  ;;  %v2532_v62 = vadd.f32 1.0, %v2531_v11  ;;  %vm2535_vm0 = vcmp.lt.f32.partialorder %v2534_v16, 0.0004427343 }
 0x549   :  { %v2503_v22 = vmul.f32 0.6931472, %v3120_v14  ;;  %v3122_v2 = vpop.eup %3121  ;;  %v2523_v29 = vadd.f32 1.0, %v2522_v42 }
 0x54a   :  { %v2537_v32 = vadd.f32 1.0, %v3122_v2  ;;  %v2540_v23 = vmul.f32 -0.5, %v3122_v2  ;;  %v2533_v33 = vmul.f32 %v3118_v27, %v2532_v62  ;;  %v2543_v37 = vand.u32 2147483647, %v3122_v2 }
 0x54b   :  { %v2509_v51 = vsel %vm2508_vm13, %v2506_v55, %v2503_v22  ;;  %v2524_v19 = vmul.f32 %v3116_v9, %v2523_v29 }
 0x54c   :  { %v2557_v58 = vadd.f32 %v2509_v51, %v2333_v57  ;;  %v3124_v3 = vpop.eup %3123  ;;  %3129 = vlog2.f32 %v2537_v32  ;;  %v2541_v8 = vadd.f32 1.0, %v2540_v23  ;;  %vm2544_vm2 = vcmp.lt.f32.partialorder %v2543_v37, 0.0004427343 }
 0x54d   :  { %v2512_v10 = vmul.f32 0.6931472, %v3124_v3 }
 0x54e   :  { %v2573_v56 = vadd.f32 0.0001, %v2557_v58  ;;  %v2542_v46 = vmul.f32 %v3122_v2, %v2541_v8 }
 0x54f   :  { %v2518_v21 = vsel %vm2517_vm14, %v2515_v20, %v2512_v10 }
 0x550   :  { %v2589_v60 = vsel %vm2321_vm1, %v2573_v56, %v3914_v0  ;;  %v2558_v63 = vadd.f32 %v2518_v21, %v2334_v6 }
 0x551   :  { %2605 = vst [vmem:[%s4082_s13 + $0x58] sm:$0xff] %v2589_v60 }
 0x552   :  { %v3126_v12 = vpop.eup %3125  ;;  %v2574_v13 = vadd.f32 0.0001, %v2558_v63 }
 0x553   :  { %v2521_v15 = vmul.f32 0.6931472, %v3126_v12 }
 0x554   :  { %v2590_v0 = vsel %vm2321_vm1, %v2574_v13, %v3944_v59 }
 0x555   :  { %v3128_v28 = vpop.eup %3127  ;;  %2606 = vst [vmem:[%s4082_s13 + $0x60] sm:$0xff] %v2590_v0  ;;  %v2527_v26 = vsel %vm2526_vm15, %v2524_v19, %v2521_v15 }
 0x556   :  { %v2559_v31 = vadd.f32 %v2527_v26, %v2335_v17  ;;  %v2530_v54 = vmul.f32 0.6931472, %v3128_v28 }
 0x558   :  { %v2575_v5 = vadd.f32 0.0001, %v2559_v31  ;;  %v2536_v38 = vsel %vm2535_vm0, %v2533_v33, %v2530_v54 }
 0x559   :  { %v2560_v59 = vadd.f32 %v2536_v38, %v2336_v34  ;;  %v3130_v61 = vpop.eup %3129 }
 0x55a   :  { %v2591_v39 = vsel %vm2321_vm1, %v2575_v5, %v3960_v18  ;;  %v2539_v1 = vmul.f32 0.6931472, %v3130_v61 }
 0x55b   :  { %2607 = vst [vmem:[%s4082_s13 + $0x68] sm:$0xff] %v2591_v39  ;;  %v2576_v40 = vadd.f32 0.0001, %v2560_v59 }
 0x55c   :  { %v2545_v18 = vsel %vm2544_vm2, %v2542_v46, %v2539_v1 }
 0x55d   :  { %v2592_v47 = vsel %vm2321_vm1, %v2576_v40, %v3975_v45  ;;  %v2561_v7 = vadd.f32 %v2545_v18, %v2337_v48 }
 0x55e   :  { %2608 = vst [vmem:[%s4082_s13 + $0x70] sm:$0xff] %v2592_v47 }
 0x55f   :  { %v2577_v49 = vadd.f32 0.0001, %v2561_v7 }
 0x561   :  { %v2593_v9 = vsel %vm2321_vm1, %v2577_v49, %v3995_v35 }
 0x562   :  { %2609 = vst [vmem:[%s4082_s13 + $0x78] sm:$0xff] %v2593_v9 }
 0x563   :  { %2614 = vsyncpa [#allocation3], 1 }
 0x564   :  { %2615 = vsyncpa [#allocation5], 1 }

</bundles_post_ra>
